<compile_context>
chip_gen: v5e
topology: v5e:2x2
jax: 0.10.0
libtpu: 0.0.40
codegen_flags: <defaults>
</compile_context>

<pallas_src>
import jax
import jax.numpy as jnp
from jax import lax
from jax.experimental import pallas as pl
from jax.experimental.pallas import tpu as pltpu


def model_cnn_kernel(idx_ref,                      # [2, B] int32   SMEM (scalar prefetch)
                     drug_hbm, prot_hbm,           # [Nd, Dd], [Np, Dp] f32  HBM (ANY)
                     wc_ref, bc_ref,               # [4, 3], [4] f32          SMEM
                     w1_ref, b1_ref,               # [4*L, H] bf16, [1, H] f32  VMEM
                     w2_ref, b2_ref,               # [1, H] f32, [1, 1] f32     VMEM
                     out_ref,                      # [B, 1] f32                 VMEM
                     x_vmem, dma_sems):            # scratch: [B, L] f32, DMA sems (2, B)
    B, L = x_vmem.shape
    Dd = drug_hbm.shape[1]
    Dp = prot_hbm.shape[1]

    # ---- fused gather: DMA the selected drug/protein rows into x_vmem -------
    copies = []
    for b in range(B):                             # B is small and static: unrolled
        cd = pltpu.make_async_copy(
            drug_hbm.at[pl.ds(idx_ref[0, b], 1), :],
            x_vmem.at[pl.ds(b, 1), pl.ds(0, Dd)],
            dma_sems.at[0, b])
        cp = pltpu.make_async_copy(
            prot_hbm.at[pl.ds(idx_ref[1, b], 1), :],
            x_vmem.at[pl.ds(b, 1), pl.ds(Dd, Dp)],
            dma_sems.at[1, b])
        cd.start()
        cp.start()
        copies += [cd, cp]
    for c in copies:
        c.wait()

    x = x_vmem[...]                                # [B, L] f32

    # ---- Conv1d(1->4, k=3, padding=1) as shifted FMAs (f32 on the VPU) ------
    col = lax.broadcasted_iota(jnp.int32, (B, L), 1)
    # x_prev[:, l] = x[:, l-1] (zero pad), x_next[:, l] = x[:, l+1] (zero pad).
    x_prev = jnp.where(col == 0, 0.0, pltpu.roll(x, shift=1, axis=1))
    x_next = jnp.where(col == L - 1, 0.0, pltpu.roll(x, shift=L - 1, axis=1))

    feats = []
    for c in range(4):                             # out_channels = 4, unrolled
        conv_c = (wc_ref[c, 0] * x_prev + wc_ref[c, 1] * x
                  + wc_ref[c, 2] * x_next + bc_ref[c])                   # [B, L]
        # MaxPool1d(2, 2): max with the left-shifted copy. Even lanes hold the
        # pooled values; odd lanes are garbage and are killed by the zero rows
        # interleaved into w1_ref (see prepare_params).
        feats.append(jnp.maximum(conv_c, pltpu.roll(conv_c, shift=L - 1, axis=1)))
    feats = jnp.concatenate(feats, axis=1)         # [B, 4*L], channel-major, lane-dense
    # TODO(synk): F.dropout(p=0.1) in the reference defaults to training=True
    # (stochastic); implemented here as identity (inference behavior).

    # ---- linear1 + ReLU on the MXU (bf16 inputs, f32 accumulation) ----------
    h = jnp.dot(feats.astype(jnp.bfloat16), w1_ref[...],
                preferred_element_type=jnp.float32) + b1_ref[...]        # [B, H]
    h = jnp.maximum(h, 0.0)

    # ---- linear2 (out_features = 1) as a VPU multiply + lane reduction ------
    o = jnp.sum(h * w2_ref[...], axis=-1, keepdims=True) + b2_ref[...]   # [B, 1]
    out_ref[...] = jax.nn.sigmoid(o).astype(out_ref.dtype)


def prepare_params(params):
    """One-time conversion of the torch-layout weights into kernel layout."""
    W1 = jnp.asarray(params["W1"], jnp.float32)    # [2*input_dim, H] == [4*Dh, H]
    n_in, n_hid = W1.shape
    dh = n_in // 4
    w1r = W1.reshape(4, dh, n_hid)
    # Interleave a zero row after every real row:
    #   w1e[c*2*dh + 2j] = W1[c*dh + j],  w1e[c*2*dh + 2j + 1] = 0
    w1e = jnp.stack([w1r, jnp.zeros_like(w1r)], axis=2).reshape(4 * 2 * dh, n_hid)
    return {
        "wc": jnp.asarray(params["wc"], jnp.float32),                 # [4, 3]
        "bc": jnp.asarray(params["bc"], jnp.float32),                 # [4]
        "w1e": w1e.astype(jnp.bfloat16),                              # [4*L, H] bf16
        "b1": jnp.asarray(params["b1"], jnp.float32).reshape(1, -1),  # [1, H]
        "w2r": jnp.asarray(params["W2"], jnp.float32).reshape(1, -1), # [1, H]
        "b2": jnp.asarray(params["b2"], jnp.float32).reshape(1, 1),   # [1, 1]
    }


def model_cnn_forward(drug_embs, protein_embs, index, labels, kparams):
    del labels                                     # unused, as in the PyTorch module
    B = index.shape[1]
    Dd, Dp = drug_embs.shape[1], protein_embs.shape[1]
    L = Dd + Dp
    n_hid = kparams["b1"].shape[1]
    assert kparams["w1e"].shape == (4 * L, n_hid)

    grid_spec = pltpu.PrefetchScalarGridSpec(
        num_scalar_prefetch=1,                     # `index` -> SMEM
        grid=(1,),                                 # tiny, latency-bound problem size
        in_specs=[
            pl.BlockSpec(memory_space=pl.ANY),                     # drug_embs   (HBM)
            pl.BlockSpec(memory_space=pl.ANY),                     # protein_embs(HBM)
            pl.BlockSpec(memory_space=pltpu.MemorySpace.SMEM),     # conv weight
            pl.BlockSpec(memory_space=pltpu.MemorySpace.SMEM),     # conv bias
            pl.BlockSpec((4 * L, n_hid), lambda i, idx: (0, 0)),   # W1 (expanded, bf16)
            pl.BlockSpec((1, n_hid), lambda i, idx: (0, 0)),       # b1
            pl.BlockSpec((1, n_hid), lambda i, idx: (0, 0)),       # W2 row
            pl.BlockSpec((1, 1), lambda i, idx: (0, 0)),           # b2
        ],
        out_specs=pl.BlockSpec((B, 1), lambda i, idx: (0, 0)),
        scratch_shapes=[
            pltpu.VMEM((B, L), jnp.float32),       # gathered pair features
            pltpu.SemaphoreType.DMA((2, B)),       # one sem per row DMA
        ],
    )
    # TODO(synk): for large B, grid over the batch with
    # dimension_semantics=("parallel",) (2 TCs on v7x) and a lane-dense output.
    out = pl.pallas_call(
        model_cnn_kernel,
        out_shape=jax.ShapeDtypeStruct((B, 1), jnp.float32),
        grid_spec=grid_spec,
        compiler_params=pltpu.CompilerParams(dimension_semantics=("arbitrary",)),
    )(index.astype(jnp.int32), drug_embs, protein_embs,
      kparams["wc"], kparams["bc"], kparams["w1e"], kparams["b1"],
      kparams["w2r"], kparams["b2"])
    return out.reshape(-1)                         # output.view(-1); sigmoid already applied


def _ref_forward(drug_embs, protein_embs, index, params):
    # pure-JAX f32 reference (mirrors the PyTorch forward, dropout as identity)
    x = jnp.concatenate([drug_embs[index[0]], protein_embs[index[1]]], axis=-1)
    xp = jnp.pad(x, ((0, 0), (1, 1)))
    conv = jnp.stack(
        [params["wc"][c, 0] * xp[:, :-2] + params["wc"][c, 1] * xp[:, 1:-1]
         + params["wc"][c, 2] * xp[:, 2:] + params["bc"][c] for c in range(4)],
        axis=1)                                    # [B, 4, L]
    pooled = jnp.max(conv.reshape(conv.shape[0], 4, -1, 2), axis=-1)
    feats = pooled.reshape(conv.shape[0], -1)      # channel-major flatten
    h = jnp.maximum(feats @ params["W1"] + params["b1"], 0.0)
    return jax.nn.sigmoid(h @ params["W2"] + params["b2"]).reshape(-1)


if __name__ == "__main__":
    drug_dim = protein_dim = 128
    input_dim = drug_dim + protein_dim             # 256; Linear(2*input_dim,128)=[512,128]
    B = 8                                          # number of (drug, protein) pairs
    Nd, Np = 32, 32                                # table sizes

    key = jax.random.PRNGKey(0)
    ks = jax.random.split(key, 10)

    drug_embs = jax.random.normal(ks[0], (Nd, drug_dim), jnp.float32)
    protein_embs = jax.random.normal(ks[1], (Np, protein_dim), jnp.float32)
    index = jnp.stack([jax.random.randint(ks[2], (B,), 0, Nd),
                       jax.random.randint(ks[3], (B,), 0, Np)], axis=0)  # [2, B]
    labels = jnp.zeros((B,), jnp.float32)          # unused by forward

    params = {
        "wc": jax.random.normal(ks[4], (4, 3), jnp.float32) / jnp.sqrt(3.0),
        "bc": jax.random.normal(ks[5], (4,), jnp.float32) * 0.1,
        "W1": jax.random.normal(ks[6], (2 * input_dim, 128), jnp.float32)
              / jnp.sqrt(2.0 * input_dim),
        "b1": jax.random.normal(ks[7], (128,), jnp.float32) * 0.1,
        "W2": jax.random.normal(ks[8], (128, 1), jnp.float32) / jnp.sqrt(128.0),
        "b2": jax.random.normal(ks[9], (1,), jnp.float32) * 0.1,
    }
    kparams = prepare_params(params)               # one-time weight preprocessing

    out = model_cnn_forward(drug_embs, protein_embs, index, labels, kparams)
    out = jax.block_until_ready(out)
    assert out.shape == (B,)

    ref = _ref_forward(drug_embs, protein_embs, index, params)
    # bf16 inputs to linear1 (f32 accumulation) => loose-but-meaningful tolerance.
    assert jnp.allclose(out, ref, atol=2e-2, rtol=2e-2), (out, ref)

    print("KERNEL_OK")
</pallas_src>

<mosaic_0001>
module attributes {stable_mosaic.version = 11 : i64} {
  func.func @model_cnn_kernel(%arg0: i32, %arg1: memref<2x8xi32, #tpu.memory_space<smem>>, %arg2: memref<32x128xf32, #tpu.memory_space<any>>, %arg3: memref<32x128xf32, #tpu.memory_space<any>>, %arg4: memref<4x3xf32, #tpu.memory_space<smem>>, %arg5: memref<4xf32, #tpu.memory_space<smem>>, %arg6: memref<1024x128xbf16, #tpu.memory_space<vmem>>, %arg7: memref<1x128xf32, #tpu.memory_space<vmem>>, %arg8: memref<1x128xf32, #tpu.memory_space<vmem>>, %arg9: memref<1x1xf32, #tpu.memory_space<vmem>>, %arg10: memref<8x1xf32, #tpu.memory_space<vmem>>, %arg11: memref<8x256xf32, #tpu.memory_space<vmem>>, %arg12: memref<2x8x!tpu.dma_semaphore, #tpu.memory_space<semaphore_mem>>) attributes {dimension_semantics = [#tpu.dimension_semantics<arbitrary>], iteration_bounds = array<i64: 1>, scalar_prefetch = 1 : i64, scratch_operands = 2 : i64, tpu.core_type = #tpu.core_type<tc>, window_params = [{}, {}, {transform_indices = @transform_2, window_bounds = array<i64: 4, 3>}, {transform_indices = @transform_3, window_bounds = array<i64: 4>}, {pipeline_mode = #tpu.pipeline_mode<synchronous>, transform_indices = @transform_4, window_bounds = array<i64: 1024, 128>}, {pipeline_mode = #tpu.pipeline_mode<synchronous>, transform_indices = @transform_5, window_bounds = array<i64: 1, 128>}, {pipeline_mode = #tpu.pipeline_mode<synchronous>, transform_indices = @transform_6, window_bounds = array<i64: 1, 128>}, {pipeline_mode = #tpu.pipeline_mode<synchronous>, transform_indices = @transform_7, window_bounds = array<i64: 1, 1>}, {pipeline_mode = #tpu.pipeline_mode<synchronous>, transform_indices = @transform_8, window_bounds = array<i64: 8, 1>}]} {
    %c0 = arith.constant 0 : index
    %c0_0 = arith.constant 0 : index
    %0 = memref.load %arg1[%c0, %c0_0] : memref<2x8xi32, #tpu.memory_space<smem>>
    %c1 = arith.constant 1 : index
    %c0_1 = arith.constant 0 : index
    %1 = memref.load %arg1[%c1, %c0_1] : memref<2x8xi32, #tpu.memory_space<smem>>
    %c0_i32 = arith.constant 0 : i32
    %c0_i32_2 = arith.constant 0 : i32
    %c0_i32_3 = arith.constant 0 : i32
    %2 = tpu.memref_slice %arg2[%0, %c0_i32_3] : memref<32x128xf32, #tpu.memory_space<any>> -> memref<1x128xf32, #tpu.memory_space<any>>
    %c0_i32_4 = arith.constant 0 : i32
    %c0_i32_5 = arith.constant 0 : i32
    %3 = tpu.memref_slice %arg11[%c0_i32_4, %c0_i32_5] : memref<8x256xf32, #tpu.memory_space<vmem>> -> memref<1x128xf32, #tpu.memory_space<vmem>>
    %4 = tpu.memref_slice %arg12[%c0_i32, %c0_i32_2] : memref<2x8x!tpu.dma_semaphore, #tpu.memory_space<semaphore_mem>> -> memref<1x1x!tpu.dma_semaphore, #tpu.memory_space<semaphore_mem>>
    %5 = tpu.memref_squeeze %4 : memref<1x1x!tpu.dma_semaphore, #tpu.memory_space<semaphore_mem>> -> memref<!tpu.dma_semaphore, #tpu.memory_space<semaphore_mem>>
    tpu.enqueue_dma source(%2 : memref<1x128xf32, #tpu.memory_space<any>>) target(%3 : memref<1x128xf32, #tpu.memory_space<vmem>>) target_semaphore(%5 : memref<!tpu.dma_semaphore, #tpu.memory_space<semaphore_mem>>)
    %c1_i32 = arith.constant 1 : i32
    %c0_i32_6 = arith.constant 0 : i32
    %c0_i32_7 = arith.constant 0 : i32
    %6 = tpu.memref_slice %arg3[%1, %c0_i32_7] : memref<32x128xf32, #tpu.memory_space<any>> -> memref<1x128xf32, #tpu.memory_space<any>>
    %c0_i32_8 = arith.constant 0 : i32
    %c128_i32 = arith.constant 128 : i32
    %7 = tpu.memref_slice %arg11[%c0_i32_8, %c128_i32] : memref<8x256xf32, #tpu.memory_space<vmem>> -> memref<1x128xf32, #tpu.memory_space<vmem>>
    %8 = tpu.memref_slice %arg12[%c1_i32, %c0_i32_6] : memref<2x8x!tpu.dma_semaphore, #tpu.memory_space<semaphore_mem>> -> memref<1x1x!tpu.dma_semaphore, #tpu.memory_space<semaphore_mem>>
    %9 = tpu.memref_squeeze %8 : memref<1x1x!tpu.dma_semaphore, #tpu.memory_space<semaphore_mem>> -> memref<!tpu.dma_semaphore, #tpu.memory_space<semaphore_mem>>
    tpu.enqueue_dma source(%6 : memref<1x128xf32, #tpu.memory_space<any>>) target(%7 : memref<1x128xf32, #tpu.memory_space<vmem>>) target_semaphore(%9 : memref<!tpu.dma_semaphore, #tpu.memory_space<semaphore_mem>>)
    %c0_9 = arith.constant 0 : index
    %c1_10 = arith.constant 1 : index
    %10 = memref.load %arg1[%c0_9, %c1_10] : memref<2x8xi32, #tpu.memory_space<smem>>
    %c1_11 = arith.constant 1 : index
    %c1_12 = arith.constant 1 : index
    %11 = memref.load %arg1[%c1_11, %c1_12] : memref<2x8xi32, #tpu.memory_space<smem>>
    %c0_i32_13 = arith.constant 0 : i32
    %c1_i32_14 = arith.constant 1 : i32
    %c0_i32_15 = arith.constant 0 : i32
    %12 = tpu.memref_slice %arg2[%10, %c0_i32_15] : memref<32x128xf32, #tpu.memory_space<any>> -> memref<1x128xf32, #tpu.memory_space<any>>
    %c1_i32_16 = arith.constant 1 : i32
    %c0_i32_17 = arith.constant 0 : i32
    %13 = tpu.memref_slice %arg11[%c1_i32_16, %c0_i32_17] : memref<8x256xf32, #tpu.memory_space<vmem>> -> memref<1x128xf32, #tpu.memory_space<vmem>>
    %14 = tpu.memref_slice %arg12[%c0_i32_13, %c1_i32_14] : memref<2x8x!tpu.dma_semaphore, #tpu.memory_space<semaphore_mem>> -> memref<1x1x!tpu.dma_semaphore, #tpu.memory_space<semaphore_mem>>
    %15 = tpu.memref_squeeze %14 : memref<1x1x!tpu.dma_semaphore, #tpu.memory_space<semaphore_mem>> -> memref<!tpu.dma_semaphore, #tpu.memory_space<semaphore_mem>>
    tpu.enqueue_dma source(%12 : memref<1x128xf32, #tpu.memory_space<any>>) target(%13 : memref<1x128xf32, #tpu.memory_space<vmem>>) target_semaphore(%15 : memref<!tpu.dma_semaphore, #tpu.memory_space<semaphore_mem>>)
    %c1_i32_18 = arith.constant 1 : i32
    %c1_i32_19 = arith.constant 1 : i32
    %c0_i32_20 = arith.constant 0 : i32
    %16 = tpu.memref_slice %arg3[%11, %c0_i32_20] : memref<32x128xf32, #tpu.memory_space<any>> -> memref<1x128xf32, #tpu.memory_space<any>>
    %c1_i32_21 = arith.constant 1 : i32
    %c128_i32_22 = arith.constant 128 : i32
    %17 = tpu.memref_slice %arg11[%c1_i32_21, %c128_i32_22] : memref<8x256xf32, #tpu.memory_space<vmem>> -> memref<1x128xf32, #tpu.memory_space<vmem>>
    %18 = tpu.memref_slice %arg12[%c1_i32_18, %c1_i32_19] : memref<2x8x!tpu.dma_semaphore, #tpu.memory_space<semaphore_mem>> -> memref<1x1x!tpu.dma_semaphore, #tpu.memory_space<semaphore_mem>>
    %19 = tpu.memref_squeeze %18 : memref<1x1x!tpu.dma_semaphore, #tpu.memory_space<semaphore_mem>> -> memref<!tpu.dma_semaphore, #tpu.memory_space<semaphore_mem>>
    tpu.enqueue_dma source(%16 : memref<1x128xf32, #tpu.memory_space<any>>) target(%17 : memref<1x128xf32, #tpu.memory_space<vmem>>) target_semaphore(%19 : memref<!tpu.dma_semaphore, #tpu.memory_space<semaphore_mem>>)
    %c0_23 = arith.constant 0 : index
    %c2 = arith.constant 2 : index
    %20 = memref.load %arg1[%c0_23, %c2] : memref<2x8xi32, #tpu.memory_space<smem>>
    %c1_24 = arith.constant 1 : index
    %c2_25 = arith.constant 2 : index
    %21 = memref.load %arg1[%c1_24, %c2_25] : memref<2x8xi32, #tpu.memory_space<smem>>
    %c0_i32_26 = arith.constant 0 : i32
    %c2_i32 = arith.constant 2 : i32
    %c0_i32_27 = arith.constant 0 : i32
    %22 = tpu.memref_slice %arg2[%20, %c0_i32_27] : memref<32x128xf32, #tpu.memory_space<any>> -> memref<1x128xf32, #tpu.memory_space<any>>
    %c2_i32_28 = arith.constant 2 : i32
    %c0_i32_29 = arith.constant 0 : i32
    %23 = tpu.memref_slice %arg11[%c2_i32_28, %c0_i32_29] : memref<8x256xf32, #tpu.memory_space<vmem>> -> memref<1x128xf32, #tpu.memory_space<vmem>>
    %24 = tpu.memref_slice %arg12[%c0_i32_26, %c2_i32] : memref<2x8x!tpu.dma_semaphore, #tpu.memory_space<semaphore_mem>> -> memref<1x1x!tpu.dma_semaphore, #tpu.memory_space<semaphore_mem>>
    %25 = tpu.memref_squeeze %24 : memref<1x1x!tpu.dma_semaphore, #tpu.memory_space<semaphore_mem>> -> memref<!tpu.dma_semaphore, #tpu.memory_space<semaphore_mem>>
    tpu.enqueue_dma source(%22 : memref<1x128xf32, #tpu.memory_space<any>>) target(%23 : memref<1x128xf32, #tpu.memory_space<vmem>>) target_semaphore(%25 : memref<!tpu.dma_semaphore, #tpu.memory_space<semaphore_mem>>)
    %c1_i32_30 = arith.constant 1 : i32
    %c2_i32_31 = arith.constant 2 : i32
    %c0_i32_32 = arith.constant 0 : i32
    %26 = tpu.memref_slice %arg3[%21, %c0_i32_32] : memref<32x128xf32, #tpu.memory_space<any>> -> memref<1x128xf32, #tpu.memory_space<any>>
    %c2_i32_33 = arith.constant 2 : i32
    %c128_i32_34 = arith.constant 128 : i32
    %27 = tpu.memref_slice %arg11[%c2_i32_33, %c128_i32_34] : memref<8x256xf32, #tpu.memory_space<vmem>> -> memref<1x128xf32, #tpu.memory_space<vmem>>
    %28 = tpu.memref_slice %arg12[%c1_i32_30, %c2_i32_31] : memref<2x8x!tpu.dma_semaphore, #tpu.memory_space<semaphore_mem>> -> memref<1x1x!tpu.dma_semaphore, #tpu.memory_space<semaphore_mem>>
    %29 = tpu.memref_squeeze %28 : memref<1x1x!tpu.dma_semaphore, #tpu.memory_space<semaphore_mem>> -> memref<!tpu.dma_semaphore, #tpu.memory_space<semaphore_mem>>
    tpu.enqueue_dma source(%26 : memref<1x128xf32, #tpu.memory_space<any>>) target(%27 : memref<1x128xf32, #tpu.memory_space<vmem>>) target_semaphore(%29 : memref<!tpu.dma_semaphore, #tpu.memory_space<semaphore_mem>>)
    %c0_35 = arith.constant 0 : index
    %c3 = arith.constant 3 : index
    %30 = memref.load %arg1[%c0_35, %c3] : memref<2x8xi32, #tpu.memory_space<smem>>
    %c1_36 = arith.constant 1 : index
    %c3_37 = arith.constant 3 : index
    %31 = memref.load %arg1[%c1_36, %c3_37] : memref<2x8xi32, #tpu.memory_space<smem>>
    %c0_i32_38 = arith.constant 0 : i32
    %c3_i32 = arith.constant 3 : i32
    %c0_i32_39 = arith.constant 0 : i32
    %32 = tpu.memref_slice %arg2[%30, %c0_i32_39] : memref<32x128xf32, #tpu.memory_space<any>> -> memref<1x128xf32, #tpu.memory_space<any>>
    %c3_i32_40 = arith.constant 3 : i32
    %c0_i32_41 = arith.constant 0 : i32
    %33 = tpu.memref_slice %arg11[%c3_i32_40, %c0_i32_41] : memref<8x256xf32, #tpu.memory_space<vmem>> -> memref<1x128xf32, #tpu.memory_space<vmem>>
    %34 = tpu.memref_slice %arg12[%c0_i32_38, %c3_i32] : memref<2x8x!tpu.dma_semaphore, #tpu.memory_space<semaphore_mem>> -> memref<1x1x!tpu.dma_semaphore, #tpu.memory_space<semaphore_mem>>
    %35 = tpu.memref_squeeze %34 : memref<1x1x!tpu.dma_semaphore, #tpu.memory_space<semaphore_mem>> -> memref<!tpu.dma_semaphore, #tpu.memory_space<semaphore_mem>>
    tpu.enqueue_dma source(%32 : memref<1x128xf32, #tpu.memory_space<any>>) target(%33 : memref<1x128xf32, #tpu.memory_space<vmem>>) target_semaphore(%35 : memref<!tpu.dma_semaphore, #tpu.memory_space<semaphore_mem>>)
    %c1_i32_42 = arith.constant 1 : i32
    %c3_i32_43 = arith.constant 3 : i32
    %c0_i32_44 = arith.constant 0 : i32
    %36 = tpu.memref_slice %arg3[%31, %c0_i32_44] : memref<32x128xf32, #tpu.memory_space<any>> -> memref<1x128xf32, #tpu.memory_space<any>>
    %c3_i32_45 = arith.constant 3 : i32
    %c128_i32_46 = arith.constant 128 : i32
    %37 = tpu.memref_slice %arg11[%c3_i32_45, %c128_i32_46] : memref<8x256xf32, #tpu.memory_space<vmem>> -> memref<1x128xf32, #tpu.memory_space<vmem>>
    %38 = tpu.memref_slice %arg12[%c1_i32_42, %c3_i32_43] : memref<2x8x!tpu.dma_semaphore, #tpu.memory_space<semaphore_mem>> -> memref<1x1x!tpu.dma_semaphore, #tpu.memory_space<semaphore_mem>>
    %39 = tpu.memref_squeeze %38 : memref<1x1x!tpu.dma_semaphore, #tpu.memory_space<semaphore_mem>> -> memref<!tpu.dma_semaphore, #tpu.memory_space<semaphore_mem>>
    tpu.enqueue_dma source(%36 : memref<1x128xf32, #tpu.memory_space<any>>) target(%37 : memref<1x128xf32, #tpu.memory_space<vmem>>) target_semaphore(%39 : memref<!tpu.dma_semaphore, #tpu.memory_space<semaphore_mem>>)
    %c0_47 = arith.constant 0 : index
    %c4 = arith.constant 4 : index
    %40 = memref.load %arg1[%c0_47, %c4] : memref<2x8xi32, #tpu.memory_space<smem>>
    %c1_48 = arith.constant 1 : index
    %c4_49 = arith.constant 4 : index
    %41 = memref.load %arg1[%c1_48, %c4_49] : memref<2x8xi32, #tpu.memory_space<smem>>
    %c0_i32_50 = arith.constant 0 : i32
    %c4_i32 = arith.constant 4 : i32
    %c0_i32_51 = arith.constant 0 : i32
    %42 = tpu.memref_slice %arg2[%40, %c0_i32_51] : memref<32x128xf32, #tpu.memory_space<any>> -> memref<1x128xf32, #tpu.memory_space<any>>
    %c4_i32_52 = arith.constant 4 : i32
    %c0_i32_53 = arith.constant 0 : i32
    %43 = tpu.memref_slice %arg11[%c4_i32_52, %c0_i32_53] : memref<8x256xf32, #tpu.memory_space<vmem>> -> memref<1x128xf32, #tpu.memory_space<vmem>>
    %44 = tpu.memref_slice %arg12[%c0_i32_50, %c4_i32] : memref<2x8x!tpu.dma_semaphore, #tpu.memory_space<semaphore_mem>> -> memref<1x1x!tpu.dma_semaphore, #tpu.memory_space<semaphore_mem>>
    %45 = tpu.memref_squeeze %44 : memref<1x1x!tpu.dma_semaphore, #tpu.memory_space<semaphore_mem>> -> memref<!tpu.dma_semaphore, #tpu.memory_space<semaphore_mem>>
    tpu.enqueue_dma source(%42 : memref<1x128xf32, #tpu.memory_space<any>>) target(%43 : memref<1x128xf32, #tpu.memory_space<vmem>>) target_semaphore(%45 : memref<!tpu.dma_semaphore, #tpu.memory_space<semaphore_mem>>)
    %c1_i32_54 = arith.constant 1 : i32
    %c4_i32_55 = arith.constant 4 : i32
    %c0_i32_56 = arith.constant 0 : i32
    %46 = tpu.memref_slice %arg3[%41, %c0_i32_56] : memref<32x128xf32, #tpu.memory_space<any>> -> memref<1x128xf32, #tpu.memory_space<any>>
    %c4_i32_57 = arith.constant 4 : i32
    %c128_i32_58 = arith.constant 128 : i32
    %47 = tpu.memref_slice %arg11[%c4_i32_57, %c128_i32_58] : memref<8x256xf32, #tpu.memory_space<vmem>> -> memref<1x128xf32, #tpu.memory_space<vmem>>
    %48 = tpu.memref_slice %arg12[%c1_i32_54, %c4_i32_55] : memref<2x8x!tpu.dma_semaphore, #tpu.memory_space<semaphore_mem>> -> memref<1x1x!tpu.dma_semaphore, #tpu.memory_space<semaphore_mem>>
    %49 = tpu.memref_squeeze %48 : memref<1x1x!tpu.dma_semaphore, #tpu.memory_space<semaphore_mem>> -> memref<!tpu.dma_semaphore, #tpu.memory_space<semaphore_mem>>
    tpu.enqueue_dma source(%46 : memref<1x128xf32, #tpu.memory_space<any>>) target(%47 : memref<1x128xf32, #tpu.memory_space<vmem>>) target_semaphore(%49 : memref<!tpu.dma_semaphore, #tpu.memory_space<semaphore_mem>>)
    %c0_59 = arith.constant 0 : index
    %c5 = arith.constant 5 : index
    %50 = memref.load %arg1[%c0_59, %c5] : memref<2x8xi32, #tpu.memory_space<smem>>
    %c1_60 = arith.constant 1 : index
    %c5_61 = arith.constant 5 : index
    %51 = memref.load %arg1[%c1_60, %c5_61] : memref<2x8xi32, #tpu.memory_space<smem>>
    %c0_i32_62 = arith.constant 0 : i32
    %c5_i32 = arith.constant 5 : i32
    %c0_i32_63 = arith.constant 0 : i32
    %52 = tpu.memref_slice %arg2[%50, %c0_i32_63] : memref<32x128xf32, #tpu.memory_space<any>> -> memref<1x128xf32, #tpu.memory_space<any>>
    %c5_i32_64 = arith.constant 5 : i32
    %c0_i32_65 = arith.constant 0 : i32
    %53 = tpu.memref_slice %arg11[%c5_i32_64, %c0_i32_65] : memref<8x256xf32, #tpu.memory_space<vmem>> -> memref<1x128xf32, #tpu.memory_space<vmem>>
    %54 = tpu.memref_slice %arg12[%c0_i32_62, %c5_i32] : memref<2x8x!tpu.dma_semaphore, #tpu.memory_space<semaphore_mem>> -> memref<1x1x!tpu.dma_semaphore, #tpu.memory_space<semaphore_mem>>
    %55 = tpu.memref_squeeze %54 : memref<1x1x!tpu.dma_semaphore, #tpu.memory_space<semaphore_mem>> -> memref<!tpu.dma_semaphore, #tpu.memory_space<semaphore_mem>>
    tpu.enqueue_dma source(%52 : memref<1x128xf32, #tpu.memory_space<any>>) target(%53 : memref<1x128xf32, #tpu.memory_space<vmem>>) target_semaphore(%55 : memref<!tpu.dma_semaphore, #tpu.memory_space<semaphore_mem>>)
    %c1_i32_66 = arith.constant 1 : i32
    %c5_i32_67 = arith.constant 5 : i32
    %c0_i32_68 = arith.constant 0 : i32
    %56 = tpu.memref_slice %arg3[%51, %c0_i32_68] : memref<32x128xf32, #tpu.memory_space<any>> -> memref<1x128xf32, #tpu.memory_space<any>>
    %c5_i32_69 = arith.constant 5 : i32
    %c128_i32_70 = arith.constant 128 : i32
    %57 = tpu.memref_slice %arg11[%c5_i32_69, %c128_i32_70] : memref<8x256xf32, #tpu.memory_space<vmem>> -> memref<1x128xf32, #tpu.memory_space<vmem>>
    %58 = tpu.memref_slice %arg12[%c1_i32_66, %c5_i32_67] : memref<2x8x!tpu.dma_semaphore, #tpu.memory_space<semaphore_mem>> -> memref<1x1x!tpu.dma_semaphore, #tpu.memory_space<semaphore_mem>>
    %59 = tpu.memref_squeeze %58 : memref<1x1x!tpu.dma_semaphore, #tpu.memory_space<semaphore_mem>> -> memref<!tpu.dma_semaphore, #tpu.memory_space<semaphore_mem>>
    tpu.enqueue_dma source(%56 : memref<1x128xf32, #tpu.memory_space<any>>) target(%57 : memref<1x128xf32, #tpu.memory_space<vmem>>) target_semaphore(%59 : memref<!tpu.dma_semaphore, #tpu.memory_space<semaphore_mem>>)
    %c0_71 = arith.constant 0 : index
    %c6 = arith.constant 6 : index
    %60 = memref.load %arg1[%c0_71, %c6] : memref<2x8xi32, #tpu.memory_space<smem>>
    %c1_72 = arith.constant 1 : index
    %c6_73 = arith.constant 6 : index
    %61 = memref.load %arg1[%c1_72, %c6_73] : memref<2x8xi32, #tpu.memory_space<smem>>
    %c0_i32_74 = arith.constant 0 : i32
    %c6_i32 = arith.constant 6 : i32
    %c0_i32_75 = arith.constant 0 : i32
    %62 = tpu.memref_slice %arg2[%60, %c0_i32_75] : memref<32x128xf32, #tpu.memory_space<any>> -> memref<1x128xf32, #tpu.memory_space<any>>
    %c6_i32_76 = arith.constant 6 : i32
    %c0_i32_77 = arith.constant 0 : i32
    %63 = tpu.memref_slice %arg11[%c6_i32_76, %c0_i32_77] : memref<8x256xf32, #tpu.memory_space<vmem>> -> memref<1x128xf32, #tpu.memory_space<vmem>>
    %64 = tpu.memref_slice %arg12[%c0_i32_74, %c6_i32] : memref<2x8x!tpu.dma_semaphore, #tpu.memory_space<semaphore_mem>> -> memref<1x1x!tpu.dma_semaphore, #tpu.memory_space<semaphore_mem>>
    %65 = tpu.memref_squeeze %64 : memref<1x1x!tpu.dma_semaphore, #tpu.memory_space<semaphore_mem>> -> memref<!tpu.dma_semaphore, #tpu.memory_space<semaphore_mem>>
    tpu.enqueue_dma source(%62 : memref<1x128xf32, #tpu.memory_space<any>>) target(%63 : memref<1x128xf32, #tpu.memory_space<vmem>>) target_semaphore(%65 : memref<!tpu.dma_semaphore, #tpu.memory_space<semaphore_mem>>)
    %c1_i32_78 = arith.constant 1 : i32
    %c6_i32_79 = arith.constant 6 : i32
    %c0_i32_80 = arith.constant 0 : i32
    %66 = tpu.memref_slice %arg3[%61, %c0_i32_80] : memref<32x128xf32, #tpu.memory_space<any>> -> memref<1x128xf32, #tpu.memory_space<any>>
    %c6_i32_81 = arith.constant 6 : i32
    %c128_i32_82 = arith.constant 128 : i32
    %67 = tpu.memref_slice %arg11[%c6_i32_81, %c128_i32_82] : memref<8x256xf32, #tpu.memory_space<vmem>> -> memref<1x128xf32, #tpu.memory_space<vmem>>
    %68 = tpu.memref_slice %arg12[%c1_i32_78, %c6_i32_79] : memref<2x8x!tpu.dma_semaphore, #tpu.memory_space<semaphore_mem>> -> memref<1x1x!tpu.dma_semaphore, #tpu.memory_space<semaphore_mem>>
    %69 = tpu.memref_squeeze %68 : memref<1x1x!tpu.dma_semaphore, #tpu.memory_space<semaphore_mem>> -> memref<!tpu.dma_semaphore, #tpu.memory_space<semaphore_mem>>
    tpu.enqueue_dma source(%66 : memref<1x128xf32, #tpu.memory_space<any>>) target(%67 : memref<1x128xf32, #tpu.memory_space<vmem>>) target_semaphore(%69 : memref<!tpu.dma_semaphore, #tpu.memory_space<semaphore_mem>>)
    %c0_83 = arith.constant 0 : index
    %c7 = arith.constant 7 : index
    %70 = memref.load %arg1[%c0_83, %c7] : memref<2x8xi32, #tpu.memory_space<smem>>
    %c1_84 = arith.constant 1 : index
    %c7_85 = arith.constant 7 : index
    %71 = memref.load %arg1[%c1_84, %c7_85] : memref<2x8xi32, #tpu.memory_space<smem>>
    %c0_i32_86 = arith.constant 0 : i32
    %c7_i32 = arith.constant 7 : i32
    %c0_i32_87 = arith.constant 0 : i32
    %72 = tpu.memref_slice %arg2[%70, %c0_i32_87] : memref<32x128xf32, #tpu.memory_space<any>> -> memref<1x128xf32, #tpu.memory_space<any>>
    %c7_i32_88 = arith.constant 7 : i32
    %c0_i32_89 = arith.constant 0 : i32
    %73 = tpu.memref_slice %arg11[%c7_i32_88, %c0_i32_89] : memref<8x256xf32, #tpu.memory_space<vmem>> -> memref<1x128xf32, #tpu.memory_space<vmem>>
    %74 = tpu.memref_slice %arg12[%c0_i32_86, %c7_i32] : memref<2x8x!tpu.dma_semaphore, #tpu.memory_space<semaphore_mem>> -> memref<1x1x!tpu.dma_semaphore, #tpu.memory_space<semaphore_mem>>
    %75 = tpu.memref_squeeze %74 : memref<1x1x!tpu.dma_semaphore, #tpu.memory_space<semaphore_mem>> -> memref<!tpu.dma_semaphore, #tpu.memory_space<semaphore_mem>>
    tpu.enqueue_dma source(%72 : memref<1x128xf32, #tpu.memory_space<any>>) target(%73 : memref<1x128xf32, #tpu.memory_space<vmem>>) target_semaphore(%75 : memref<!tpu.dma_semaphore, #tpu.memory_space<semaphore_mem>>)
    %c1_i32_90 = arith.constant 1 : i32
    %c7_i32_91 = arith.constant 7 : i32
    %c0_i32_92 = arith.constant 0 : i32
    %76 = tpu.memref_slice %arg3[%71, %c0_i32_92] : memref<32x128xf32, #tpu.memory_space<any>> -> memref<1x128xf32, #tpu.memory_space<any>>
    %c7_i32_93 = arith.constant 7 : i32
    %c128_i32_94 = arith.constant 128 : i32
    %77 = tpu.memref_slice %arg11[%c7_i32_93, %c128_i32_94] : memref<8x256xf32, #tpu.memory_space<vmem>> -> memref<1x128xf32, #tpu.memory_space<vmem>>
    %78 = tpu.memref_slice %arg12[%c1_i32_90, %c7_i32_91] : memref<2x8x!tpu.dma_semaphore, #tpu.memory_space<semaphore_mem>> -> memref<1x1x!tpu.dma_semaphore, #tpu.memory_space<semaphore_mem>>
    %79 = tpu.memref_squeeze %78 : memref<1x1x!tpu.dma_semaphore, #tpu.memory_space<semaphore_mem>> -> memref<!tpu.dma_semaphore, #tpu.memory_space<semaphore_mem>>
    tpu.enqueue_dma source(%76 : memref<1x128xf32, #tpu.memory_space<any>>) target(%77 : memref<1x128xf32, #tpu.memory_space<vmem>>) target_semaphore(%79 : memref<!tpu.dma_semaphore, #tpu.memory_space<semaphore_mem>>)
    %c0_i32_95 = arith.constant 0 : i32
    %c0_i32_96 = arith.constant 0 : i32
    %c0_i32_97 = arith.constant 0 : i32
    %80 = tpu.memref_slice %arg2[%0, %c0_i32_97] : memref<32x128xf32, #tpu.memory_space<any>> -> memref<1x128xf32, #tpu.memory_space<any>>
    %c0_i32_98 = arith.constant 0 : i32
    %c0_i32_99 = arith.constant 0 : i32
    %81 = tpu.memref_slice %arg11[%c0_i32_98, %c0_i32_99] : memref<8x256xf32, #tpu.memory_space<vmem>> -> memref<1x128xf32, #tpu.memory_space<vmem>>
    %82 = tpu.memref_slice %arg12[%c0_i32_95, %c0_i32_96] : memref<2x8x!tpu.dma_semaphore, #tpu.memory_space<semaphore_mem>> -> memref<1x1x!tpu.dma_semaphore, #tpu.memory_space<semaphore_mem>>
    %83 = tpu.memref_squeeze %82 : memref<1x1x!tpu.dma_semaphore, #tpu.memory_space<semaphore_mem>> -> memref<!tpu.dma_semaphore, #tpu.memory_space<semaphore_mem>>
    tpu.wait_dma2 semaphore(%83 : memref<!tpu.dma_semaphore, #tpu.memory_space<semaphore_mem>>) src(%80 : memref<1x128xf32, #tpu.memory_space<any>>) dst(%81 : memref<1x128xf32, #tpu.memory_space<vmem>>)
    %c1_i32_100 = arith.constant 1 : i32
    %c0_i32_101 = arith.constant 0 : i32
    %c0_i32_102 = arith.constant 0 : i32
    %84 = tpu.memref_slice %arg3[%1, %c0_i32_102] : memref<32x128xf32, #tpu.memory_space<any>> -> memref<1x128xf32, #tpu.memory_space<any>>
    %c0_i32_103 = arith.constant 0 : i32
    %c128_i32_104 = arith.constant 128 : i32
    %85 = tpu.memref_slice %arg11[%c0_i32_103, %c128_i32_104] : memref<8x256xf32, #tpu.memory_space<vmem>> -> memref<1x128xf32, #tpu.memory_space<vmem>>
    %86 = tpu.memref_slice %arg12[%c1_i32_100, %c0_i32_101] : memref<2x8x!tpu.dma_semaphore, #tpu.memory_space<semaphore_mem>> -> memref<1x1x!tpu.dma_semaphore, #tpu.memory_space<semaphore_mem>>
    %87 = tpu.memref_squeeze %86 : memref<1x1x!tpu.dma_semaphore, #tpu.memory_space<semaphore_mem>> -> memref<!tpu.dma_semaphore, #tpu.memory_space<semaphore_mem>>
    tpu.wait_dma2 semaphore(%87 : memref<!tpu.dma_semaphore, #tpu.memory_space<semaphore_mem>>) src(%84 : memref<1x128xf32, #tpu.memory_space<any>>) dst(%85 : memref<1x128xf32, #tpu.memory_space<vmem>>)
    %c0_i32_105 = arith.constant 0 : i32
    %c1_i32_106 = arith.constant 1 : i32
    %c0_i32_107 = arith.constant 0 : i32
    %88 = tpu.memref_slice %arg2[%10, %c0_i32_107] : memref<32x128xf32, #tpu.memory_space<any>> -> memref<1x128xf32, #tpu.memory_space<any>>
    %c1_i32_108 = arith.constant 1 : i32
    %c0_i32_109 = arith.constant 0 : i32
    %89 = tpu.memref_slice %arg11[%c1_i32_108, %c0_i32_109] : memref<8x256xf32, #tpu.memory_space<vmem>> -> memref<1x128xf32, #tpu.memory_space<vmem>>
    %90 = tpu.memref_slice %arg12[%c0_i32_105, %c1_i32_106] : memref<2x8x!tpu.dma_semaphore, #tpu.memory_space<semaphore_mem>> -> memref<1x1x!tpu.dma_semaphore, #tpu.memory_space<semaphore_mem>>
    %91 = tpu.memref_squeeze %90 : memref<1x1x!tpu.dma_semaphore, #tpu.memory_space<semaphore_mem>> -> memref<!tpu.dma_semaphore, #tpu.memory_space<semaphore_mem>>
    tpu.wait_dma2 semaphore(%91 : memref<!tpu.dma_semaphore, #tpu.memory_space<semaphore_mem>>) src(%88 : memref<1x128xf32, #tpu.memory_space<any>>) dst(%89 : memref<1x128xf32, #tpu.memory_space<vmem>>)
    %c1_i32_110 = arith.constant 1 : i32
    %c1_i32_111 = arith.constant 1 : i32
    %c0_i32_112 = arith.constant 0 : i32
    %92 = tpu.memref_slice %arg3[%11, %c0_i32_112] : memref<32x128xf32, #tpu.memory_space<any>> -> memref<1x128xf32, #tpu.memory_space<any>>
    %c1_i32_113 = arith.constant 1 : i32
    %c128_i32_114 = arith.constant 128 : i32
    %93 = tpu.memref_slice %arg11[%c1_i32_113, %c128_i32_114] : memref<8x256xf32, #tpu.memory_space<vmem>> -> memref<1x128xf32, #tpu.memory_space<vmem>>
    %94 = tpu.memref_slice %arg12[%c1_i32_110, %c1_i32_111] : memref<2x8x!tpu.dma_semaphore, #tpu.memory_space<semaphore_mem>> -> memref<1x1x!tpu.dma_semaphore, #tpu.memory_space<semaphore_mem>>
    %95 = tpu.memref_squeeze %94 : memref<1x1x!tpu.dma_semaphore, #tpu.memory_space<semaphore_mem>> -> memref<!tpu.dma_semaphore, #tpu.memory_space<semaphore_mem>>
    tpu.wait_dma2 semaphore(%95 : memref<!tpu.dma_semaphore, #tpu.memory_space<semaphore_mem>>) src(%92 : memref<1x128xf32, #tpu.memory_space<any>>) dst(%93 : memref<1x128xf32, #tpu.memory_space<vmem>>)
    %c0_i32_115 = arith.constant 0 : i32
    %c2_i32_116 = arith.constant 2 : i32
    %c0_i32_117 = arith.constant 0 : i32
    %96 = tpu.memref_slice %arg2[%20, %c0_i32_117] : memref<32x128xf32, #tpu.memory_space<any>> -> memref<1x128xf32, #tpu.memory_space<any>>
    %c2_i32_118 = arith.constant 2 : i32
    %c0_i32_119 = arith.constant 0 : i32
    %97 = tpu.memref_slice %arg11[%c2_i32_118, %c0_i32_119] : memref<8x256xf32, #tpu.memory_space<vmem>> -> memref<1x128xf32, #tpu.memory_space<vmem>>
    %98 = tpu.memref_slice %arg12[%c0_i32_115, %c2_i32_116] : memref<2x8x!tpu.dma_semaphore, #tpu.memory_space<semaphore_mem>> -> memref<1x1x!tpu.dma_semaphore, #tpu.memory_space<semaphore_mem>>
    %99 = tpu.memref_squeeze %98 : memref<1x1x!tpu.dma_semaphore, #tpu.memory_space<semaphore_mem>> -> memref<!tpu.dma_semaphore, #tpu.memory_space<semaphore_mem>>
    tpu.wait_dma2 semaphore(%99 : memref<!tpu.dma_semaphore, #tpu.memory_space<semaphore_mem>>) src(%96 : memref<1x128xf32, #tpu.memory_space<any>>) dst(%97 : memref<1x128xf32, #tpu.memory_space<vmem>>)
    %c1_i32_120 = arith.constant 1 : i32
    %c2_i32_121 = arith.constant 2 : i32
    %c0_i32_122 = arith.constant 0 : i32
    %100 = tpu.memref_slice %arg3[%21, %c0_i32_122] : memref<32x128xf32, #tpu.memory_space<any>> -> memref<1x128xf32, #tpu.memory_space<any>>
    %c2_i32_123 = arith.constant 2 : i32
    %c128_i32_124 = arith.constant 128 : i32
    %101 = tpu.memref_slice %arg11[%c2_i32_123, %c128_i32_124] : memref<8x256xf32, #tpu.memory_space<vmem>> -> memref<1x128xf32, #tpu.memory_space<vmem>>
    %102 = tpu.memref_slice %arg12[%c1_i32_120, %c2_i32_121] : memref<2x8x!tpu.dma_semaphore, #tpu.memory_space<semaphore_mem>> -> memref<1x1x!tpu.dma_semaphore, #tpu.memory_space<semaphore_mem>>
    %103 = tpu.memref_squeeze %102 : memref<1x1x!tpu.dma_semaphore, #tpu.memory_space<semaphore_mem>> -> memref<!tpu.dma_semaphore, #tpu.memory_space<semaphore_mem>>
    tpu.wait_dma2 semaphore(%103 : memref<!tpu.dma_semaphore, #tpu.memory_space<semaphore_mem>>) src(%100 : memref<1x128xf32, #tpu.memory_space<any>>) dst(%101 : memref<1x128xf32, #tpu.memory_space<vmem>>)
    %c0_i32_125 = arith.constant 0 : i32
    %c3_i32_126 = arith.constant 3 : i32
    %c0_i32_127 = arith.constant 0 : i32
    %104 = tpu.memref_slice %arg2[%30, %c0_i32_127] : memref<32x128xf32, #tpu.memory_space<any>> -> memref<1x128xf32, #tpu.memory_space<any>>
    %c3_i32_128 = arith.constant 3 : i32
    %c0_i32_129 = arith.constant 0 : i32
    %105 = tpu.memref_slice %arg11[%c3_i32_128, %c0_i32_129] : memref<8x256xf32, #tpu.memory_space<vmem>> -> memref<1x128xf32, #tpu.memory_space<vmem>>
    %106 = tpu.memref_slice %arg12[%c0_i32_125, %c3_i32_126] : memref<2x8x!tpu.dma_semaphore, #tpu.memory_space<semaphore_mem>> -> memref<1x1x!tpu.dma_semaphore, #tpu.memory_space<semaphore_mem>>
    %107 = tpu.memref_squeeze %106 : memref<1x1x!tpu.dma_semaphore, #tpu.memory_space<semaphore_mem>> -> memref<!tpu.dma_semaphore, #tpu.memory_space<semaphore_mem>>
    tpu.wait_dma2 semaphore(%107 : memref<!tpu.dma_semaphore, #tpu.memory_space<semaphore_mem>>) src(%104 : memref<1x128xf32, #tpu.memory_space<any>>) dst(%105 : memref<1x128xf32, #tpu.memory_space<vmem>>)
    %c1_i32_130 = arith.constant 1 : i32
    %c3_i32_131 = arith.constant 3 : i32
    %c0_i32_132 = arith.constant 0 : i32
    %108 = tpu.memref_slice %arg3[%31, %c0_i32_132] : memref<32x128xf32, #tpu.memory_space<any>> -> memref<1x128xf32, #tpu.memory_space<any>>
    %c3_i32_133 = arith.constant 3 : i32
    %c128_i32_134 = arith.constant 128 : i32
    %109 = tpu.memref_slice %arg11[%c3_i32_133, %c128_i32_134] : memref<8x256xf32, #tpu.memory_space<vmem>> -> memref<1x128xf32, #tpu.memory_space<vmem>>
    %110 = tpu.memref_slice %arg12[%c1_i32_130, %c3_i32_131] : memref<2x8x!tpu.dma_semaphore, #tpu.memory_space<semaphore_mem>> -> memref<1x1x!tpu.dma_semaphore, #tpu.memory_space<semaphore_mem>>
    %111 = tpu.memref_squeeze %110 : memref<1x1x!tpu.dma_semaphore, #tpu.memory_space<semaphore_mem>> -> memref<!tpu.dma_semaphore, #tpu.memory_space<semaphore_mem>>
    tpu.wait_dma2 semaphore(%111 : memref<!tpu.dma_semaphore, #tpu.memory_space<semaphore_mem>>) src(%108 : memref<1x128xf32, #tpu.memory_space<any>>) dst(%109 : memref<1x128xf32, #tpu.memory_space<vmem>>)
    %c0_i32_135 = arith.constant 0 : i32
    %c4_i32_136 = arith.constant 4 : i32
    %c0_i32_137 = arith.constant 0 : i32
    %112 = tpu.memref_slice %arg2[%40, %c0_i32_137] : memref<32x128xf32, #tpu.memory_space<any>> -> memref<1x128xf32, #tpu.memory_space<any>>
    %c4_i32_138 = arith.constant 4 : i32
    %c0_i32_139 = arith.constant 0 : i32
    %113 = tpu.memref_slice %arg11[%c4_i32_138, %c0_i32_139] : memref<8x256xf32, #tpu.memory_space<vmem>> -> memref<1x128xf32, #tpu.memory_space<vmem>>
    %114 = tpu.memref_slice %arg12[%c0_i32_135, %c4_i32_136] : memref<2x8x!tpu.dma_semaphore, #tpu.memory_space<semaphore_mem>> -> memref<1x1x!tpu.dma_semaphore, #tpu.memory_space<semaphore_mem>>
    %115 = tpu.memref_squeeze %114 : memref<1x1x!tpu.dma_semaphore, #tpu.memory_space<semaphore_mem>> -> memref<!tpu.dma_semaphore, #tpu.memory_space<semaphore_mem>>
    tpu.wait_dma2 semaphore(%115 : memref<!tpu.dma_semaphore, #tpu.memory_space<semaphore_mem>>) src(%112 : memref<1x128xf32, #tpu.memory_space<any>>) dst(%113 : memref<1x128xf32, #tpu.memory_space<vmem>>)
    %c1_i32_140 = arith.constant 1 : i32
    %c4_i32_141 = arith.constant 4 : i32
    %c0_i32_142 = arith.constant 0 : i32
    %116 = tpu.memref_slice %arg3[%41, %c0_i32_142] : memref<32x128xf32, #tpu.memory_space<any>> -> memref<1x128xf32, #tpu.memory_space<any>>
    %c4_i32_143 = arith.constant 4 : i32
    %c128_i32_144 = arith.constant 128 : i32
    %117 = tpu.memref_slice %arg11[%c4_i32_143, %c128_i32_144] : memref<8x256xf32, #tpu.memory_space<vmem>> -> memref<1x128xf32, #tpu.memory_space<vmem>>
    %118 = tpu.memref_slice %arg12[%c1_i32_140, %c4_i32_141] : memref<2x8x!tpu.dma_semaphore, #tpu.memory_space<semaphore_mem>> -> memref<1x1x!tpu.dma_semaphore, #tpu.memory_space<semaphore_mem>>
    %119 = tpu.memref_squeeze %118 : memref<1x1x!tpu.dma_semaphore, #tpu.memory_space<semaphore_mem>> -> memref<!tpu.dma_semaphore, #tpu.memory_space<semaphore_mem>>
    tpu.wait_dma2 semaphore(%119 : memref<!tpu.dma_semaphore, #tpu.memory_space<semaphore_mem>>) src(%116 : memref<1x128xf32, #tpu.memory_space<any>>) dst(%117 : memref<1x128xf32, #tpu.memory_space<vmem>>)
    %c0_i32_145 = arith.constant 0 : i32
    %c5_i32_146 = arith.constant 5 : i32
    %c0_i32_147 = arith.constant 0 : i32
    %120 = tpu.memref_slice %arg2[%50, %c0_i32_147] : memref<32x128xf32, #tpu.memory_space<any>> -> memref<1x128xf32, #tpu.memory_space<any>>
    %c5_i32_148 = arith.constant 5 : i32
    %c0_i32_149 = arith.constant 0 : i32
    %121 = tpu.memref_slice %arg11[%c5_i32_148, %c0_i32_149] : memref<8x256xf32, #tpu.memory_space<vmem>> -> memref<1x128xf32, #tpu.memory_space<vmem>>
    %122 = tpu.memref_slice %arg12[%c0_i32_145, %c5_i32_146] : memref<2x8x!tpu.dma_semaphore, #tpu.memory_space<semaphore_mem>> -> memref<1x1x!tpu.dma_semaphore, #tpu.memory_space<semaphore_mem>>
    %123 = tpu.memref_squeeze %122 : memref<1x1x!tpu.dma_semaphore, #tpu.memory_space<semaphore_mem>> -> memref<!tpu.dma_semaphore, #tpu.memory_space<semaphore_mem>>
    tpu.wait_dma2 semaphore(%123 : memref<!tpu.dma_semaphore, #tpu.memory_space<semaphore_mem>>) src(%120 : memref<1x128xf32, #tpu.memory_space<any>>) dst(%121 : memref<1x128xf32, #tpu.memory_space<vmem>>)
    %c1_i32_150 = arith.constant 1 : i32
    %c5_i32_151 = arith.constant 5 : i32
    %c0_i32_152 = arith.constant 0 : i32
    %124 = tpu.memref_slice %arg3[%51, %c0_i32_152] : memref<32x128xf32, #tpu.memory_space<any>> -> memref<1x128xf32, #tpu.memory_space<any>>
    %c5_i32_153 = arith.constant 5 : i32
    %c128_i32_154 = arith.constant 128 : i32
    %125 = tpu.memref_slice %arg11[%c5_i32_153, %c128_i32_154] : memref<8x256xf32, #tpu.memory_space<vmem>> -> memref<1x128xf32, #tpu.memory_space<vmem>>
    %126 = tpu.memref_slice %arg12[%c1_i32_150, %c5_i32_151] : memref<2x8x!tpu.dma_semaphore, #tpu.memory_space<semaphore_mem>> -> memref<1x1x!tpu.dma_semaphore, #tpu.memory_space<semaphore_mem>>
    %127 = tpu.memref_squeeze %126 : memref<1x1x!tpu.dma_semaphore, #tpu.memory_space<semaphore_mem>> -> memref<!tpu.dma_semaphore, #tpu.memory_space<semaphore_mem>>
    tpu.wait_dma2 semaphore(%127 : memref<!tpu.dma_semaphore, #tpu.memory_space<semaphore_mem>>) src(%124 : memref<1x128xf32, #tpu.memory_space<any>>) dst(%125 : memref<1x128xf32, #tpu.memory_space<vmem>>)
    %c0_i32_155 = arith.constant 0 : i32
    %c6_i32_156 = arith.constant 6 : i32
    %c0_i32_157 = arith.constant 0 : i32
    %128 = tpu.memref_slice %arg2[%60, %c0_i32_157] : memref<32x128xf32, #tpu.memory_space<any>> -> memref<1x128xf32, #tpu.memory_space<any>>
    %c6_i32_158 = arith.constant 6 : i32
    %c0_i32_159 = arith.constant 0 : i32
    %129 = tpu.memref_slice %arg11[%c6_i32_158, %c0_i32_159] : memref<8x256xf32, #tpu.memory_space<vmem>> -> memref<1x128xf32, #tpu.memory_space<vmem>>
    %130 = tpu.memref_slice %arg12[%c0_i32_155, %c6_i32_156] : memref<2x8x!tpu.dma_semaphore, #tpu.memory_space<semaphore_mem>> -> memref<1x1x!tpu.dma_semaphore, #tpu.memory_space<semaphore_mem>>
    %131 = tpu.memref_squeeze %130 : memref<1x1x!tpu.dma_semaphore, #tpu.memory_space<semaphore_mem>> -> memref<!tpu.dma_semaphore, #tpu.memory_space<semaphore_mem>>
    tpu.wait_dma2 semaphore(%131 : memref<!tpu.dma_semaphore, #tpu.memory_space<semaphore_mem>>) src(%128 : memref<1x128xf32, #tpu.memory_space<any>>) dst(%129 : memref<1x128xf32, #tpu.memory_space<vmem>>)
    %c1_i32_160 = arith.constant 1 : i32
    %c6_i32_161 = arith.constant 6 : i32
    %c0_i32_162 = arith.constant 0 : i32
    %132 = tpu.memref_slice %arg3[%61, %c0_i32_162] : memref<32x128xf32, #tpu.memory_space<any>> -> memref<1x128xf32, #tpu.memory_space<any>>
    %c6_i32_163 = arith.constant 6 : i32
    %c128_i32_164 = arith.constant 128 : i32
    %133 = tpu.memref_slice %arg11[%c6_i32_163, %c128_i32_164] : memref<8x256xf32, #tpu.memory_space<vmem>> -> memref<1x128xf32, #tpu.memory_space<vmem>>
    %134 = tpu.memref_slice %arg12[%c1_i32_160, %c6_i32_161] : memref<2x8x!tpu.dma_semaphore, #tpu.memory_space<semaphore_mem>> -> memref<1x1x!tpu.dma_semaphore, #tpu.memory_space<semaphore_mem>>
    %135 = tpu.memref_squeeze %134 : memref<1x1x!tpu.dma_semaphore, #tpu.memory_space<semaphore_mem>> -> memref<!tpu.dma_semaphore, #tpu.memory_space<semaphore_mem>>
    tpu.wait_dma2 semaphore(%135 : memref<!tpu.dma_semaphore, #tpu.memory_space<semaphore_mem>>) src(%132 : memref<1x128xf32, #tpu.memory_space<any>>) dst(%133 : memref<1x128xf32, #tpu.memory_space<vmem>>)
    %c0_i32_165 = arith.constant 0 : i32
    %c7_i32_166 = arith.constant 7 : i32
    %c0_i32_167 = arith.constant 0 : i32
    %136 = tpu.memref_slice %arg2[%70, %c0_i32_167] : memref<32x128xf32, #tpu.memory_space<any>> -> memref<1x128xf32, #tpu.memory_space<any>>
    %c7_i32_168 = arith.constant 7 : i32
    %c0_i32_169 = arith.constant 0 : i32
    %137 = tpu.memref_slice %arg11[%c7_i32_168, %c0_i32_169] : memref<8x256xf32, #tpu.memory_space<vmem>> -> memref<1x128xf32, #tpu.memory_space<vmem>>
    %138 = tpu.memref_slice %arg12[%c0_i32_165, %c7_i32_166] : memref<2x8x!tpu.dma_semaphore, #tpu.memory_space<semaphore_mem>> -> memref<1x1x!tpu.dma_semaphore, #tpu.memory_space<semaphore_mem>>
    %139 = tpu.memref_squeeze %138 : memref<1x1x!tpu.dma_semaphore, #tpu.memory_space<semaphore_mem>> -> memref<!tpu.dma_semaphore, #tpu.memory_space<semaphore_mem>>
    tpu.wait_dma2 semaphore(%139 : memref<!tpu.dma_semaphore, #tpu.memory_space<semaphore_mem>>) src(%136 : memref<1x128xf32, #tpu.memory_space<any>>) dst(%137 : memref<1x128xf32, #tpu.memory_space<vmem>>)
    %c1_i32_170 = arith.constant 1 : i32
    %c7_i32_171 = arith.constant 7 : i32
    %c0_i32_172 = arith.constant 0 : i32
    %140 = tpu.memref_slice %arg3[%71, %c0_i32_172] : memref<32x128xf32, #tpu.memory_space<any>> -> memref<1x128xf32, #tpu.memory_space<any>>
    %c7_i32_173 = arith.constant 7 : i32
    %c128_i32_174 = arith.constant 128 : i32
    %141 = tpu.memref_slice %arg11[%c7_i32_173, %c128_i32_174] : memref<8x256xf32, #tpu.memory_space<vmem>> -> memref<1x128xf32, #tpu.memory_space<vmem>>
    %142 = tpu.memref_slice %arg12[%c1_i32_170, %c7_i32_171] : memref<2x8x!tpu.dma_semaphore, #tpu.memory_space<semaphore_mem>> -> memref<1x1x!tpu.dma_semaphore, #tpu.memory_space<semaphore_mem>>
    %143 = tpu.memref_squeeze %142 : memref<1x1x!tpu.dma_semaphore, #tpu.memory_space<semaphore_mem>> -> memref<!tpu.dma_semaphore, #tpu.memory_space<semaphore_mem>>
    tpu.wait_dma2 semaphore(%143 : memref<!tpu.dma_semaphore, #tpu.memory_space<semaphore_mem>>) src(%140 : memref<1x128xf32, #tpu.memory_space<any>>) dst(%141 : memref<1x128xf32, #tpu.memory_space<vmem>>)
    %c0_175 = arith.constant 0 : index
    %c0_176 = arith.constant 0 : index
    %144 = vector.load %arg11[%c0_175, %c0_176] : memref<8x256xf32, #tpu.memory_space<vmem>>, vector<8x256xf32>
    %145 = tpu.iota {dimensions = array<i32: 1>} : vector<8x256xi32>
    %c0_i32_177 = arith.constant 0 : i32
    %146 = vector.broadcast %c0_i32_177 : i32 to vector<8x256xi32>
    %147 = arith.cmpi eq, %145, %146 : vector<8x256xi32>
    %c1_i32_178 = arith.constant 1 : i32
    %148 = tpu.dynamic_rotate %144 by %c1_i32_178 dim 1 : vector<8x256xf32>, i32 -> vector<8x256xf32>
    %cst = arith.constant 0.000000e+00 : f32
    %149 = vector.broadcast %cst : f32 to vector<8x256xf32>
    %150 = arith.select %147, %149, %148 : vector<8x256xi1>, vector<8x256xf32>
    %c255_i32 = arith.constant 255 : i32
    %151 = vector.broadcast %c255_i32 : i32 to vector<8x256xi32>
    %152 = arith.cmpi eq, %145, %151 : vector<8x256xi32>
    %c255_i32_179 = arith.constant 255 : i32
    %153 = tpu.dynamic_rotate %144 by %c255_i32_179 dim 1 : vector<8x256xf32>, i32 -> vector<8x256xf32>
    %cst_180 = arith.constant 0.000000e+00 : f32
    %154 = vector.broadcast %cst_180 : f32 to vector<8x256xf32>
    %155 = arith.select %152, %154, %153 : vector<8x256xi1>, vector<8x256xf32>
    %c0_181 = arith.constant 0 : index
    %c0_182 = arith.constant 0 : index
    %156 = memref.load %arg4[%c0_181, %c0_182] : memref<4x3xf32, #tpu.memory_space<smem>>
    %157 = vector.broadcast %156 : f32 to vector<8x256xf32>
    %158 = arith.mulf %157, %150 : vector<8x256xf32>
    %c0_183 = arith.constant 0 : index
    %c1_184 = arith.constant 1 : index
    %159 = memref.load %arg4[%c0_183, %c1_184] : memref<4x3xf32, #tpu.memory_space<smem>>
    %160 = vector.broadcast %159 : f32 to vector<8x256xf32>
    %161 = arith.mulf %160, %144 : vector<8x256xf32>
    %162 = arith.addf %158, %161 : vector<8x256xf32>
    %c0_185 = arith.constant 0 : index
    %c2_186 = arith.constant 2 : index
    %163 = memref.load %arg4[%c0_185, %c2_186] : memref<4x3xf32, #tpu.memory_space<smem>>
    %164 = vector.broadcast %163 : f32 to vector<8x256xf32>
    %165 = arith.mulf %164, %155 : vector<8x256xf32>
    %166 = arith.addf %162, %165 : vector<8x256xf32>
    %c0_187 = arith.constant 0 : index
    %167 = memref.load %arg5[%c0_187] : memref<4xf32, #tpu.memory_space<smem>>
    %168 = vector.broadcast %167 : f32 to vector<8x256xf32>
    %169 = arith.addf %166, %168 : vector<8x256xf32>
    %c255_i32_188 = arith.constant 255 : i32
    %170 = tpu.dynamic_rotate %169 by %c255_i32_188 dim 1 : vector<8x256xf32>, i32 -> vector<8x256xf32>
    %171 = arith.maximumf %169, %170 : vector<8x256xf32>
    %c1_189 = arith.constant 1 : index
    %c0_190 = arith.constant 0 : index
    %172 = memref.load %arg4[%c1_189, %c0_190] : memref<4x3xf32, #tpu.memory_space<smem>>
    %173 = vector.broadcast %172 : f32 to vector<8x256xf32>
    %174 = arith.mulf %173, %150 : vector<8x256xf32>
    %c1_191 = arith.constant 1 : index
    %c1_192 = arith.constant 1 : index
    %175 = memref.load %arg4[%c1_191, %c1_192] : memref<4x3xf32, #tpu.memory_space<smem>>
    %176 = vector.broadcast %175 : f32 to vector<8x256xf32>
    %177 = arith.mulf %176, %144 : vector<8x256xf32>
    %178 = arith.addf %174, %177 : vector<8x256xf32>
    %c1_193 = arith.constant 1 : index
    %c2_194 = arith.constant 2 : index
    %179 = memref.load %arg4[%c1_193, %c2_194] : memref<4x3xf32, #tpu.memory_space<smem>>
    %180 = vector.broadcast %179 : f32 to vector<8x256xf32>
    %181 = arith.mulf %180, %155 : vector<8x256xf32>
    %182 = arith.addf %178, %181 : vector<8x256xf32>
    %c1_195 = arith.constant 1 : index
    %183 = memref.load %arg5[%c1_195] : memref<4xf32, #tpu.memory_space<smem>>
    %184 = vector.broadcast %183 : f32 to vector<8x256xf32>
    %185 = arith.addf %182, %184 : vector<8x256xf32>
    %c255_i32_196 = arith.constant 255 : i32
    %186 = tpu.dynamic_rotate %185 by %c255_i32_196 dim 1 : vector<8x256xf32>, i32 -> vector<8x256xf32>
    %187 = arith.maximumf %185, %186 : vector<8x256xf32>
    %c2_197 = arith.constant 2 : index
    %c0_198 = arith.constant 0 : index
    %188 = memref.load %arg4[%c2_197, %c0_198] : memref<4x3xf32, #tpu.memory_space<smem>>
    %189 = vector.broadcast %188 : f32 to vector<8x256xf32>
    %190 = arith.mulf %189, %150 : vector<8x256xf32>
    %c2_199 = arith.constant 2 : index
    %c1_200 = arith.constant 1 : index
    %191 = memref.load %arg4[%c2_199, %c1_200] : memref<4x3xf32, #tpu.memory_space<smem>>
    %192 = vector.broadcast %191 : f32 to vector<8x256xf32>
    %193 = arith.mulf %192, %144 : vector<8x256xf32>
    %194 = arith.addf %190, %193 : vector<8x256xf32>
    %c2_201 = arith.constant 2 : index
    %c2_202 = arith.constant 2 : index
    %195 = memref.load %arg4[%c2_201, %c2_202] : memref<4x3xf32, #tpu.memory_space<smem>>
    %196 = vector.broadcast %195 : f32 to vector<8x256xf32>
    %197 = arith.mulf %196, %155 : vector<8x256xf32>
    %198 = arith.addf %194, %197 : vector<8x256xf32>
    %c2_203 = arith.constant 2 : index
    %199 = memref.load %arg5[%c2_203] : memref<4xf32, #tpu.memory_space<smem>>
    %200 = vector.broadcast %199 : f32 to vector<8x256xf32>
    %201 = arith.addf %198, %200 : vector<8x256xf32>
    %c255_i32_204 = arith.constant 255 : i32
    %202 = tpu.dynamic_rotate %201 by %c255_i32_204 dim 1 : vector<8x256xf32>, i32 -> vector<8x256xf32>
    %203 = arith.maximumf %201, %202 : vector<8x256xf32>
    %c3_205 = arith.constant 3 : index
    %c0_206 = arith.constant 0 : index
    %204 = memref.load %arg4[%c3_205, %c0_206] : memref<4x3xf32, #tpu.memory_space<smem>>
    %205 = vector.broadcast %204 : f32 to vector<8x256xf32>
    %206 = arith.mulf %205, %150 : vector<8x256xf32>
    %c3_207 = arith.constant 3 : index
    %c1_208 = arith.constant 1 : index
    %207 = memref.load %arg4[%c3_207, %c1_208] : memref<4x3xf32, #tpu.memory_space<smem>>
    %208 = vector.broadcast %207 : f32 to vector<8x256xf32>
    %209 = arith.mulf %208, %144 : vector<8x256xf32>
    %210 = arith.addf %206, %209 : vector<8x256xf32>
    %c3_209 = arith.constant 3 : index
    %c2_210 = arith.constant 2 : index
    %211 = memref.load %arg4[%c3_209, %c2_210] : memref<4x3xf32, #tpu.memory_space<smem>>
    %212 = vector.broadcast %211 : f32 to vector<8x256xf32>
    %213 = arith.mulf %212, %155 : vector<8x256xf32>
    %214 = arith.addf %210, %213 : vector<8x256xf32>
    %c3_211 = arith.constant 3 : index
    %215 = memref.load %arg5[%c3_211] : memref<4xf32, #tpu.memory_space<smem>>
    %216 = vector.broadcast %215 : f32 to vector<8x256xf32>
    %217 = arith.addf %214, %216 : vector<8x256xf32>
    %c255_i32_212 = arith.constant 255 : i32
    %218 = tpu.dynamic_rotate %217 by %c255_i32_212 dim 1 : vector<8x256xf32>, i32 -> vector<8x256xf32>
    %219 = arith.maximumf %217, %218 : vector<8x256xf32>
    %220 = tpu.concatenate %171, %187, %203, %219 in 1 : vector<8x256xf32>, vector<8x256xf32>, vector<8x256xf32>, vector<8x256xf32> -> vector<8x1024xf32>
    %221 = arith.truncf %220 : vector<8x1024xf32> to vector<8x1024xbf16>
    %c0_213 = arith.constant 0 : index
    %c0_214 = arith.constant 0 : index
    %222 = vector.load %arg6[%c0_213, %c0_214] : memref<1024x128xbf16, #tpu.memory_space<vmem>>, vector<1024x128xbf16>
    %cst_215 = arith.constant dense<0.000000e+00> : vector<8x128xf32>
    %223 = tpu.matmul %221, %222, %cst_215 {dimension_numbers = #tpu.dot_dimension_numbers<[1], [0], [0], [1], [0, 0, 1, 1], [], []>} : vector<8x1024xbf16>, vector<1024x128xbf16>, vector<8x128xf32> -> vector<8x128xf32>
    %c0_216 = arith.constant 0 : index
    %c0_217 = arith.constant 0 : index
    %224 = vector.load %arg7[%c0_216, %c0_217] : memref<1x128xf32, #tpu.memory_space<vmem>>, vector<1x128xf32>
    %225 = vector.broadcast %224 : vector<1x128xf32> to vector<8x128xf32>
    %226 = arith.addf %223, %225 : vector<8x128xf32>
    %cst_218 = arith.constant 0.000000e+00 : f32
    %227 = vector.broadcast %cst_218 : f32 to vector<8x128xf32>
    %228 = arith.maximumf %226, %227 : vector<8x128xf32>
    %c0_219 = arith.constant 0 : index
    %c0_220 = arith.constant 0 : index
    %229 = vector.load %arg8[%c0_219, %c0_220] : memref<1x128xf32, #tpu.memory_space<vmem>>, vector<1x128xf32>
    %230 = vector.broadcast %229 : vector<1x128xf32> to vector<8x128xf32>
    %231 = arith.mulf %228, %230 : vector<8x128xf32>
    %cst_221 = arith.constant dense<0.000000e+00> : vector<8xf32>
    %232 = vector.multi_reduction <add>, %231, %cst_221 [1] : vector<8x128xf32> to vector<8xf32>
    %233 = vector.shape_cast %232 : vector<8xf32> to vector<8x1xf32>
    %c0_222 = arith.constant 0 : index
    %c0_223 = arith.constant 0 : index
    %234 = vector.load %arg9[%c0_222, %c0_223] : memref<1x1xf32, #tpu.memory_space<vmem>>, vector<1x1xf32>
    %235 = vector.broadcast %234 : vector<1x1xf32> to vector<8x1xf32>
    %236 = arith.addf %233, %235 : vector<8x1xf32>
    %237 = arith.negf %236 : vector<8x1xf32>
    %238 = math.exp %237 : vector<8x1xf32>
    %cst_224 = arith.constant 1.000000e+00 : f32
    %239 = vector.broadcast %cst_224 : f32 to vector<8x1xf32>
    %240 = arith.addf %239, %238 : vector<8x1xf32>
    %241 = arith.divf %239, %240 : vector<8x1xf32>
    %c0_225 = arith.constant 0 : index
    %c0_226 = arith.constant 0 : index
    %242 = vector.load %arg10[%c0_225, %c0_226] : memref<8x1xf32, #tpu.memory_space<vmem>>, vector<8x1xf32>
    tpu.vector_store %arg10[%c0_225, %c0_226], %241 {strides = array<i32>} : memref<8x1xf32, #tpu.memory_space<vmem>>, vector<8x1xf32>,
    return
  }
  func.func @transform_2(%arg0: i32, %arg1: memref<2x8xi32, #tpu.memory_space<smem>>) -> (i32, i32) {
    %c0_i32 = arith.constant 0 : i32
    %c0_i32_0 = arith.constant 0 : i32
    %c0_i32_1 = arith.constant 0 : i32
    return %c0_i32, %c0_i32_0 : i32, i32
  }
  func.func @transform_3(%arg0: i32, %arg1: memref<2x8xi32, #tpu.memory_space<smem>>) -> i32 {
    %c0_i32 = arith.constant 0 : i32
    %c0_i32_0 = arith.constant 0 : i32
    return %c0_i32 : i32
  }
  func.func @transform_4(%arg0: i32, %arg1: memref<2x8xi32, #tpu.memory_space<smem>>) -> (i32, i32) {
    %c0_i32 = arith.constant 0 : i32
    %c0_i32_0 = arith.constant 0 : i32
    %c0_i32_1 = arith.constant 0 : i32
    return %c0_i32, %c0_i32_0 : i32, i32
  }
  func.func @transform_5(%arg0: i32, %arg1: memref<2x8xi32, #tpu.memory_space<smem>>) -> (i32, i32) {
    %c0_i32 = arith.constant 0 : i32
    %c0_i32_0 = arith.constant 0 : i32
    %c0_i32_1 = arith.constant 0 : i32
    return %c0_i32, %c0_i32_0 : i32, i32
  }
  func.func @transform_6(%arg0: i32, %arg1: memref<2x8xi32, #tpu.memory_space<smem>>) -> (i32, i32) {
    %c0_i32 = arith.constant 0 : i32
    %c0_i32_0 = arith.constant 0 : i32
    %c0_i32_1 = arith.constant 0 : i32
    return %c0_i32, %c0_i32_0 : i32, i32
  }
  func.func @transform_7(%arg0: i32, %arg1: memref<2x8xi32, #tpu.memory_space<smem>>) -> (i32, i32) {
    %c0_i32 = arith.constant 0 : i32
    %c0_i32_0 = arith.constant 0 : i32
    %c0_i32_1 = arith.constant 0 : i32
    return %c0_i32, %c0_i32_0 : i32, i32
  }
  func.func @transform_8(%arg0: i32, %arg1: memref<2x8xi32, #tpu.memory_space<smem>>) -> (i32, i32) {
    %c0_i32 = arith.constant 0 : i32
    %c0_i32_0 = arith.constant 0 : i32
    %c0_i32_1 = arith.constant 0 : i32
    return %c0_i32, %c0_i32_0 : i32, i32
  }
}

</mosaic_0001>

<bundles_post_ra>
// kernel: tpu_custom_call.1
= control target key start
LH: loop header
LB: loop body
LE: loop exit
PB: predicated region body
PF: predicated region fallthrough
CT: control target
= control target key end

     0   :  { %s2216_s14 = smov [#allocation5]   ;;  %s2633_s0 = inlined_call_operand.hbm [shape: s32[2,8], index: 0, kind: input, shape index: {}]   ;;  %s2634_s1 = inlined_call_operand.hbm [shape: f32[32,128], index: 1, kind: input, shape index: {}]   ;;  %s2635_s2 = inlined_call_operand.hbm [shape: f32[32,128], index: 2, kind: input, shape index: {}]   ;;  %s2636_s3 = inlined_call_operand.vmem [shape: f32[4,3], index: 3, kind: input, shape index: {}]   ;;  %s2637_s4 = inlined_call_operand.vmem [shape: f32[4], index: 4, kind: input, shape index: {}]   ;;  %s2638_s5 = inlined_call_operand.hbm [shape: bf16[1024,128], index: 5, kind: input, shape index: {}]   ;;  %s2639_s6 = inlined_call_operand.vmem [shape: f32[1,128], index: 6, kind: input, shape index: {}]   ;;  %s2640_s7 = inlined_call_operand.vmem [shape: f32[1,128], index: 7, kind: input, shape index: {}]   ;;  %s2641_s9 = inlined_call_operand.vmem [shape: f32[8,1], index: 9, kind: output, shape index: {}]   ;;  %s2642_s8 = inlined_call_operand.<no memory space> [shape: f32[1,1], index: 8, kind: input, shape index: {}]  }
   0x1   :  { %s15_s11 = sshll.u32 %s2633_s0, 4  ;;  %v19_v0 = vstv %s2642_s8  ;;  %s16_s11 = int_to_ptr.hbm [resolvable:$true] %s15_s11 }
   0x2   :  { %20 = vst [vmem:[#allocation6] sm:$0x1] %v19_v0  ;;  %18 = dma.hbm_to_smem %s16_s11, 32, %s2216_s14, [#allocation4] }
   0x3   :  { %2176 = dma.done.wait [#allocation4], 32 }
   0x4   :  { %2177 = vsyncadd [#allocation4], 4294967264 }
   0x5   :  { %23 = sfence }
   0x6   :  { %24 = vsyncpa [#allocation9], 0 }
   0x7   :  { %25 = vsyncpa [#allocation11], 0  ;;  %s32_s17 = sshll.u32 %s2636_s3, 4  ;;  %s33_s17 = int_to_ptr.vmem [resolvable:$true] %s32_s17 }
   0x8   :  { %26 = vsyncpa [#allocation8], 0  ;;  %s41_s19 = sshll.u32 %s2637_s4, 4  ;;  %s2217_s8 = smov [#allocation7]   ;;  %s42_s19 = int_to_ptr.vmem [resolvable:$true] %s41_s19 }
   0x9   :  { %35 = dma.vmem_to_smem %s33_s17, 64, %s2217_s8, [#allocation9]  }
   0xa   :  { %s2218_s20 = smov [#allocation10]   ;;  %s49_s23 = sshll.u32 %s2638_s5, 4  ;;  %s50_s23 = int_to_ptr.hbm [resolvable:$true] %s49_s23 }
   0xb   :  { %44 = dma.vmem_to_smem %s42_s19, 16, %s2218_s20, [#allocation11]  }
   0xc   :  { %s2219_s24 = smov [#allocation12]   ;;  %s2220_s3 = smov 64  }
   0xd   :  { %s51_s25 = sshll.u32 %s2219_s24, 4  ;;  %s2221_s26 = smov 4   ;;  %s52_s25 = int_to_ptr.vmem [resolvable:$true] %s51_s25 }
   0xe   :  { %57 = dma.hbm_to_vmem [thread:$0]  %s50_s23, 8192, %s52_s25, [#allocation8], %s2220_s3, %s2220_s3, %s2221_s26  }
   0xf   :  { %2178 = dma.done.wait [#allocation9], 64  }
  0x10   :  { %2179 = vsyncadd [#allocation9], 4294967232 }
  0x11   :  { %2180 = dma.done.wait [#allocation11], 16  }
  0x12   :  { %2181 = vsyncadd [#allocation11], 4294967280 }
  0x13   :  { %2182 = dma.done.wait [#allocation8], 8192  }
  0x14   :  { %2183 = vsyncadd [#allocation8], 4294959104 }
  0x15   :  { %76 = sfence }
  0x16   :  { %s77_s4 = sld [smem:[#allocation5]]  ;;  %s2222_s27 = smov [#allocation2]  }
  0x17   :  { %s89_s28 = sshll.u32 %s2222_s27, 4  ;;  %s1315_s29 = sld [smem:[#allocation5 + $0x80]]  ;;  %s90_s28 = int_to_ptr.vmem [resolvable:$true] %s89_s28 }
  0x18   :  { %s2223_s5 = smov [#allocation2 + $0x8]   ;;  %s2307_s10 = sld [smem:[#allocation5 + $0x1]] }
  0x19   :  { %s2305_s30 = sshll.u32 %s2223_s5, 4  ;;  %s2224_s11 = smov [#allocation2 + $0x1]   ;;  %s106_s30 = int_to_ptr.vmem [resolvable:$true] %s2305_s30 }
  0x1a   :  { %s2310_s12 = sshll.u32 %s2224_s11, 4  ;;  %s2312_s13 = sld [smem:[#allocation5 + $0x81]]  ;;  %s124_s12 = int_to_ptr.vmem [resolvable:$true] %s2310_s12 }
  0x1b   :  { %s2324_s24 = scalar_lea.hbm %s2634_s1, 32 }
  0x1c   :  { %s79_s16 = scalar_lea.hbm %s2634_s1, %s77_s4 }
  0x1d   :  { %s87_s17 = sshll.u32 %s79_s16, 4  ;;  %s93_s19 = scalar_lea.hbm %s2635_s2, %s1315_s29  ;;  %s88_s17 = int_to_ptr.hbm [resolvable:$true] %s87_s17 }
  0x1e   :  { %s103_s8 = sshll.u32 %s93_s19, 4  ;;  %s1792_s20 = sshra.s32 %s88_s17, 4  ;;  %s1793_s20 = int_to_ptr.hbm [resolvable:$true] %s1792_s20  ;;  %s104_s8 = int_to_ptr.hbm [resolvable:$true] %s103_s8 }
  0x1f   :  { %s1794_s21 = scalar_lea.hbm %s1793_s20, 1  ;;  %p1797_p1 = scmp.lt.s32.totalorder %s1793_s20, %s2634_s1 }
  0x20   :  { %p1795_p0 = scmp.ne.s32.totalorder %s1793_s20, %s1794_s21  ;;  %p1798_p2 = scmp.lt.s32.totalorder %s2324_s24, %s1794_s21 }
  0x22   :  { %p1799_p3 = por %p1798_p2, %p1797_p1 }
  0x24   :  { %p1800_p4 = pnand %p1799_p3, %p1795_p0 }
  0x26   :  { %1803 = shalt.err (!%p1800_p4)  }
  0x27   :  { %92 = dma.hbm_to_vmem [thread:$0]  %s88_s17, 16, %s90_s28, [#allocation3] }
  0x28   :  { %s111_s27 = scalar_lea.hbm %s2634_s1, %s2307_s10  ;;  %s1816_s29 = sshra.s32 %s104_s8, 4  ;;  %s1817_s29 = int_to_ptr.hbm [resolvable:$true] %s1816_s29 }
  0x29   :  { %s1818_s5 = scalar_lea.hbm %s1817_s29, 1  ;;  %s2337_s15 = scalar_lea.hbm %s2635_s2, 32 }
  0x2a   :  { %p1819_p5 = scmp.ne.s32.totalorder %s1817_s29, %s1818_s5  ;;  %p1821_p6 = scmp.lt.s32.totalorder %s1817_s29, %s2635_s2 }
  0x2b   :  { %p1822_p7 = scmp.lt.s32.totalorder %s2337_s15, %s1818_s5 }
  0x2d   :  { %p1823_p8 = por %p1822_p7, %p1821_p6 }
  0x2f   :  { %p1824_p9 = pnand %p1823_p8, %p1819_p5 }
  0x31   :  { %1827 = shalt.err (!%p1824_p9)  }
  0x32   :  { %108 = dma.hbm_to_vmem [thread:$0]  %s104_s8, 16, %s106_s30, [#allocation3 + $0x8] }
  0x33   :  { %s121_s28 = sshll.u32 %s111_s27, 4  ;;  %s127_s18 = scalar_lea.hbm %s2635_s2, %s2312_s13  ;;  %s122_s28 = int_to_ptr.hbm [resolvable:$true] %s121_s28 }
  0x34   :  { %s137_s19 = sshll.u32 %s127_s18, 4  ;;  %s1840_s20 = sshra.s32 %s122_s28, 4  ;;  %s1841_s20 = int_to_ptr.hbm [resolvable:$true] %s1840_s20  ;;  %s138_s19 = int_to_ptr.hbm [resolvable:$true] %s137_s19 }
  0x35   :  { %s1842_s21 = scalar_lea.hbm %s1841_s20, 1  ;;  %p1845_p11 = scmp.lt.s32.totalorder %s1841_s20, %s2634_s1 }
  0x36   :  { %p1843_p10 = scmp.ne.s32.totalorder %s1841_s20, %s1842_s21  ;;  %p1846_p12 = scmp.lt.s32.totalorder %s2324_s24, %s1842_s21 }
  0x38   :  { %p1847_p13 = por %p1846_p12, %p1845_p11 }
  0x3a   :  { %p1848_p0 = pnand %p1847_p13, %p1843_p10 }
  0x3c   :  { %1851 = shalt.err (!%p1848_p0)  }
  0x3d   :  { %126 = dma.hbm_to_vmem [thread:$0]  %s122_s28, 16, %s124_s12, [#allocation3 + $0x1] }
  0x3e   :  { %s2225_s30 = smov [#allocation2 + $0x9]   ;;  %s1318_s8 = sld [smem:[#allocation5 + $0x2]] }
  0x3f   :  { %s139_s13 = sshll.u32 %s2225_s30, 4  ;;  %s1864_s25 = sshra.s32 %s138_s19, 4  ;;  %s140_s13 = int_to_ptr.vmem [resolvable:$true] %s139_s13  ;;  %s1865_s25 = int_to_ptr.hbm [resolvable:$true] %s1864_s25 }
  0x40   :  { %s1866_s3 = scalar_lea.hbm %s1865_s25, 1  ;;  %p1869_p2 = scmp.lt.s32.totalorder %s1865_s25, %s2635_s2 }
  0x41   :  { %p1867_p1 = scmp.ne.s32.totalorder %s1865_s25, %s1866_s3  ;;  %p1870_p3 = scmp.lt.s32.totalorder %s2337_s15, %s1866_s3 }
  0x43   :  { %p1871_p4 = por %p1870_p3, %p1869_p2 }
  0x45   :  { %p1872_p5 = pnand %p1871_p4, %p1867_p1 }
  0x47   :  { %1875 = shalt.err (!%p1872_p5)  }
  0x48   :  { %142 = dma.hbm_to_vmem [thread:$0]  %s138_s19, 16, %s140_s13, [#allocation3 + $0x9] }
  0x49   :  { %s2226_s27 = smov [#allocation2 + $0x2]   ;;  %s1319_s29 = sld [smem:[#allocation5 + $0x82]] }
  0x4a   :  { %s157_s12 = sshll.u32 %s2226_s27, 4  ;;  %s2227_s5 = smov [#allocation2 + $0xa]   ;;  %s158_s12 = int_to_ptr.vmem [resolvable:$true] %s157_s12 }
  0x4b   :  { %s2359_s11 = sshll.u32 %s2227_s5, 4  ;;  %s1320_s14 = sld [smem:[#allocation5 + $0x3]]  ;;  %s174_s11 = int_to_ptr.vmem [resolvable:$true] %s2359_s11 }
  0x4c   :  { %s145_s28 = scalar_lea.hbm %s2634_s1, %s1318_s8  ;;  %s2228_s17 = smov [#allocation2 + $0x3]  }
  0x4d   :  { %s155_s10 = sshll.u32 %s145_s28, 4  ;;  %s2365_s18 = sshll.u32 %s2228_s17, 4  ;;  %s156_s10 = int_to_ptr.hbm [resolvable:$true] %s155_s10  ;;  %s192_s18 = int_to_ptr.vmem [resolvable:$true] %s2365_s18 }
  0x4e   :  { %s1888_s19 = sshra.s32 %s156_s10, 4  ;;  %s1889_s19 = int_to_ptr.hbm [resolvable:$true] %s1888_s19 }
  0x4f   :  { %s1890_s20 = scalar_lea.hbm %s1889_s19, 1  ;;  %p1893_p7 = scmp.lt.s32.totalorder %s1889_s19, %s2634_s1 }
  0x50   :  { %p1891_p6 = scmp.ne.s32.totalorder %s1889_s19, %s1890_s20  ;;  %p1894_p8 = scmp.lt.s32.totalorder %s2324_s24, %s1890_s20 }
  0x52   :  { %p1895_p9 = por %p1894_p8, %p1893_p7 }
  0x54   :  { %p1896_p10 = pnand %p1895_p9, %p1891_p6 }
  0x56   :  { %1899 = shalt.err (!%p1896_p10)  }
  0x57   :  { %160 = dma.hbm_to_vmem [thread:$0]  %s156_s10, 16, %s158_s12, [#allocation3 + $0x2] }
  0x58   :  { %s161_s13 = scalar_lea.hbm %s2635_s2, %s1319_s29  ;;  %s179_s26 = scalar_lea.hbm %s2634_s1, %s1320_s14 }
  0x59   :  { %s171_s8 = sshll.u32 %s161_s13, 4  ;;  %s189_s4 = sshll.u32 %s179_s26, 4  ;;  %s172_s8 = int_to_ptr.hbm [resolvable:$true] %s171_s8  ;;  %s190_s4 = int_to_ptr.hbm [resolvable:$true] %s189_s4 }
  0x5a   :  { %s1912_s27 = sshra.s32 %s172_s8, 4  ;;  %s1913_s27 = int_to_ptr.hbm [resolvable:$true] %s1912_s27 }
  0x5b   :  { %s1914_s5 = scalar_lea.hbm %s1913_s27, 1  ;;  %p1917_p12 = scmp.lt.s32.totalorder %s1913_s27, %s2635_s2 }
  0x5c   :  { %p1915_p11 = scmp.ne.s32.totalorder %s1913_s27, %s1914_s5  ;;  %p1918_p13 = scmp.lt.s32.totalorder %s2337_s15, %s1914_s5 }
  0x5e   :  { %p1919_p0 = por %p1918_p13, %p1917_p12 }
  0x60   :  { %p1920_p1 = pnand %p1919_p0, %p1915_p11 }
  0x62   :  { %1923 = shalt.err (!%p1920_p1)  }
  0x63   :  { %176 = dma.hbm_to_vmem [thread:$0]  %s172_s8, 16, %s174_s11, [#allocation3 + $0xa] }
  0x64   :  { %s1321_s29 = sld [smem:[#allocation5 + $0x83]]  ;;  %s1936_s14 = sshra.s32 %s190_s4, 4  ;;  %s1937_s14 = int_to_ptr.hbm [resolvable:$true] %s1936_s14 }
  0x65   :  { %s1938_s0 = scalar_lea.hbm %s1937_s14, 1  ;;  %p1941_p3 = scmp.lt.s32.totalorder %s1937_s14, %s2634_s1 }
  0x66   :  { %p1939_p2 = scmp.ne.s32.totalorder %s1937_s14, %s1938_s0  ;;  %p1942_p4 = scmp.lt.s32.totalorder %s2324_s24, %s1938_s0 }
  0x68   :  { %p1943_p5 = por %p1942_p4, %p1941_p3 }
  0x6a   :  { %p1944_p6 = pnand %p1943_p5, %p1939_p2 }
  0x6c   :  { %1947 = shalt.err (!%p1944_p6)  }
  0x6d   :  { %194 = dma.hbm_to_vmem [thread:$0]  %s190_s4, 16, %s192_s18, [#allocation3 + $0x3] }
  0x6e   :  { %s1322_s17 = sld [smem:[#allocation5 + $0x4]]  ;;  %s2229_s19 = smov [#allocation2 + $0xb]  }
  0x6f   :  { %s207_s20 = sshll.u32 %s2229_s19, 4  ;;  %s2230_s11 = smov [#allocation2 + $0x4]   ;;  %s208_s20 = int_to_ptr.vmem [resolvable:$true] %s207_s20 }
  0x70   :  { %s2388_s21 = sshll.u32 %s2230_s11, 4  ;;  %s2391_s22 = sld [smem:[#allocation5 + $0x84]]  ;;  %s226_s21 = int_to_ptr.vmem [resolvable:$true] %s2388_s21 }
  0x71   :  { %s195_s13 = scalar_lea.hbm %s2635_s2, %s1321_s29  ;;  %s2231_s25 = smov [#allocation2 + $0xc]  }
  0x72   :  { %s205_s8 = sshll.u32 %s195_s13, 4  ;;  %s2396_s3 = sshll.u32 %s2231_s25, 4  ;;  %s206_s8 = int_to_ptr.hbm [resolvable:$true] %s205_s8  ;;  %s242_s3 = int_to_ptr.vmem [resolvable:$true] %s2396_s3 }
  0x73   :  { %s1960_s27 = sshra.s32 %s206_s8, 4  ;;  %s1961_s27 = int_to_ptr.hbm [resolvable:$true] %s1960_s27 }
  0x74   :  { %s213_s4 = scalar_lea.hbm %s2634_s1, %s1322_s17  ;;  %s1962_s5 = scalar_lea.hbm %s1961_s27, 1 }
  0x75   :  { %p1963_p7 = scmp.ne.s32.totalorder %s1961_s27, %s1962_s5  ;;  %p1965_p8 = scmp.lt.s32.totalorder %s1961_s27, %s2635_s2 }
  0x76   :  { %p1966_p9 = scmp.lt.s32.totalorder %s2337_s15, %s1962_s5 }
  0x78   :  { %p1967_p10 = por %p1966_p9, %p1965_p8 }
  0x7a   :  { %p1968_p11 = pnand %p1967_p10, %p1963_p7 }
  0x7c   :  { %1971 = shalt.err (!%p1968_p11)  }
  0x7d   :  { %210 = dma.hbm_to_vmem [thread:$0]  %s206_s8, 16, %s208_s20, [#allocation3 + $0xb] }
  0x7e   :  { %s223_s29 = sshll.u32 %s213_s4, 4  ;;  %s229_s28 = scalar_lea.hbm %s2635_s2, %s2391_s22  ;;  %s224_s29 = int_to_ptr.hbm [resolvable:$true] %s223_s29 }
  0x7f   :  { %s1984_s10 = sshra.s32 %s224_s29, 4  ;;  %s1985_s10 = int_to_ptr.hbm [resolvable:$true] %s1984_s10 }
  0x80   :  { %s1986_s17 = scalar_lea.hbm %s1985_s10, 1  ;;  %p1989_p13 = scmp.lt.s32.totalorder %s1985_s10, %s2634_s1 }
  0x81   :  { %p1987_p12 = scmp.ne.s32.totalorder %s1985_s10, %s1986_s17  ;;  %p1990_p0 = scmp.lt.s32.totalorder %s2324_s24, %s1986_s17 }
  0x83   :  { %p1991_p1 = por %p1990_p0, %p1989_p13 }
  0x85   :  { %p1992_p2 = pnand %p1991_p1, %p1987_p12 }
  0x87   :  { %1995 = shalt.err (!%p1992_p2)  }
  0x88   :  { %228 = dma.hbm_to_vmem [thread:$0]  %s224_s29, 16, %s226_s21, [#allocation3 + $0x4] }
  0x89   :  { %s239_s20 = sshll.u32 %s229_s28, 4  ;;  %s1324_s23 = sld [smem:[#allocation5 + $0x5]]  ;;  %s240_s20 = int_to_ptr.hbm [resolvable:$true] %s239_s20 }
  0x8a   :  { %s2008_s22 = sshra.s32 %s240_s20, 4  ;;  %s2009_s22 = int_to_ptr.hbm [resolvable:$true] %s2008_s22 }
  0x8b   :  { %s2010_s30 = scalar_lea.hbm %s2009_s22, 1  ;;  %p2013_p4 = scmp.lt.s32.totalorder %s2009_s22, %s2635_s2 }
  0x8c   :  { %p2011_p3 = scmp.ne.s32.totalorder %s2009_s22, %s2010_s30  ;;  %p2014_p5 = scmp.lt.s32.totalorder %s2337_s15, %s2010_s30 }
  0x8e   :  { %p2015_p6 = por %p2014_p5, %p2013_p4 }
  0x90   :  { %p2016_p7 = pnand %p2015_p6, %p2011_p3 }
  0x92   :  { %2019 = shalt.err (!%p2016_p7)  }
  0x93   :  { %244 = dma.hbm_to_vmem [thread:$0]  %s240_s20, 16, %s242_s3, [#allocation3 + $0xc] }
  0x94   :  { %s2232_s25 = smov [#allocation2 + $0x5]   ;;  %s1325_s26 = sld [smem:[#allocation5 + $0x85]] }
  0x95   :  { %s259_s18 = sshll.u32 %s2232_s25, 4  ;;  %s2233_s21 = smov [#allocation2 + $0xd]   ;;  %s260_s18 = int_to_ptr.vmem [resolvable:$true] %s259_s18 }
  0x96   :  { %s2420_s4 = sshll.u32 %s2233_s21, 4  ;;  %s1326_s27 = sld [smem:[#allocation5 + $0x6]]  ;;  %s276_s4 = int_to_ptr.vmem [resolvable:$true] %s2420_s4 }
  0x97   :  { %s247_s12 = scalar_lea.hbm %s2634_s1, %s1324_s23  ;;  %s2234_s14 = smov [#allocation2 + $0x6]  }
  0x98   :  { %s257_s29 = sshll.u32 %s247_s12, 4  ;;  %s2426_s0 = sshll.u32 %s2234_s14, 4  ;;  %s258_s29 = int_to_ptr.hbm [resolvable:$true] %s257_s29  ;;  %s294_s0 = int_to_ptr.vmem [resolvable:$true] %s2426_s0 }
  0x99   :  { %s2032_s3 = sshra.s32 %s258_s29, 4  ;;  %s2033_s3 = int_to_ptr.hbm [resolvable:$true] %s2032_s3 }
  0x9a   :  { %s2034_s28 = scalar_lea.hbm %s2033_s3, 1  ;;  %p2037_p9 = scmp.lt.s32.totalorder %s2033_s3, %s2634_s1 }
  0x9b   :  { %p2035_p8 = scmp.ne.s32.totalorder %s2033_s3, %s2034_s28  ;;  %p2038_p10 = scmp.lt.s32.totalorder %s2324_s24, %s2034_s28 }
  0x9d   :  { %p2039_p11 = por %p2038_p10, %p2037_p9 }
  0x9f   :  { %p2040_p12 = pnand %p2039_p11, %p2035_p8 }
  0xa1   :  { %2043 = shalt.err (!%p2040_p12)  }
  0xa2   :  { %262 = dma.hbm_to_vmem [thread:$0]  %s258_s29, 16, %s260_s18, [#allocation3 + $0x5] }
  0xa3   :  { %s263_s20 = scalar_lea.hbm %s2635_s2, %s1325_s26  ;;  %s281_s13 = scalar_lea.hbm %s2634_s1, %s1326_s27 }
  0xa4   :  { %s273_s23 = sshll.u32 %s263_s20, 4  ;;  %s291_s8 = sshll.u32 %s281_s13, 4  ;;  %s274_s23 = int_to_ptr.hbm [resolvable:$true] %s273_s23  ;;  %s292_s8 = int_to_ptr.hbm [resolvable:$true] %s291_s8 }
  0xa5   :  { %s2056_s25 = sshra.s32 %s274_s23, 4  ;;  %s2057_s25 = int_to_ptr.hbm [resolvable:$true] %s2056_s25 }
  0xa6   :  { %s2058_s21 = scalar_lea.hbm %s2057_s25, 1  ;;  %p2061_p0 = scmp.lt.s32.totalorder %s2057_s25, %s2635_s2 }
  0xa7   :  { %p2059_p13 = scmp.ne.s32.totalorder %s2057_s25, %s2058_s21  ;;  %p2062_p1 = scmp.lt.s32.totalorder %s2337_s15, %s2058_s21 }
  0xa9   :  { %p2063_p2 = por %p2062_p1, %p2061_p0 }
  0xab   :  { %p2064_p3 = pnand %p2063_p2, %p2059_p13 }
  0xad   :  { %2067 = shalt.err (!%p2064_p3)  }
  0xae   :  { %278 = dma.hbm_to_vmem [thread:$0]  %s274_s23, 16, %s276_s4, [#allocation3 + $0xd] }
  0xaf   :  { %s1327_s26 = sld [smem:[#allocation5 + $0x86]]  ;;  %s2080_s27 = sshra.s32 %s292_s8, 4  ;;  %s2081_s27 = int_to_ptr.hbm [resolvable:$true] %s2080_s27 }
  0xb0   :  { %s2082_s16 = scalar_lea.hbm %s2081_s27, 1  ;;  %p2085_p5 = scmp.lt.s32.totalorder %s2081_s27, %s2634_s1 }
  0xb1   :  { %p2083_p4 = scmp.ne.s32.totalorder %s2081_s27, %s2082_s16  ;;  %p2086_p6 = scmp.lt.s32.totalorder %s2324_s24, %s2082_s16 }
  0xb3   :  { %p2087_p7 = por %p2086_p6, %p2085_p5 }
  0xb5   :  { %p2088_p8 = pnand %p2087_p7, %p2083_p4 }
  0xb7   :  { %2091 = shalt.err (!%p2088_p8)  }
  0xb8   :  { %296 = dma.hbm_to_vmem [thread:$0]  %s292_s8, 16, %s294_s0, [#allocation3 + $0x6] }
  0xb9   :  { %s1328_s14 = sld [smem:[#allocation5 + $0x7]]  ;;  %s2235_s3 = smov [#allocation2 + $0xe]  }
  0xba   :  { %s309_s28 = sshll.u32 %s2235_s3, 4  ;;  %s2236_s4 = smov [#allocation2 + $0x7]   ;;  %s310_s28 = int_to_ptr.vmem [resolvable:$true] %s309_s28 }
  0xbb   :  { %s2449_s10 = sshll.u32 %s2236_s4, 4  ;;  %s2452_s17 = sld [smem:[#allocation5 + $0x87]]  ;;  %s328_s10 = int_to_ptr.vmem [resolvable:$true] %s2449_s10 }
  0xbc   :  { %s297_s20 = scalar_lea.hbm %s2635_s2, %s1327_s26  ;;  %s2237_s22 = smov [#allocation2 + $0xf]  }
  0xbd   :  { %s307_s23 = sshll.u32 %s297_s20, 4  ;;  %s2457_s30 = sshll.u32 %s2237_s22, 4  ;;  %s308_s23 = int_to_ptr.hbm [resolvable:$true] %s307_s23  ;;  %s344_s30 = int_to_ptr.vmem [resolvable:$true] %s2457_s30 }
  0xbe   :  { %s2104_s25 = sshra.s32 %s308_s23, 4  ;;  %s2105_s25 = int_to_ptr.hbm [resolvable:$true] %s2104_s25 }
  0xbf   :  { %s315_s8 = scalar_lea.hbm %s2634_s1, %s1328_s14  ;;  %s2106_s21 = scalar_lea.hbm %s2105_s25, 1 }
  0xc0   :  { %p2107_p9 = scmp.ne.s32.totalorder %s2105_s25, %s2106_s21  ;;  %p2109_p10 = scmp.lt.s32.totalorder %s2105_s25, %s2635_s2 }
  0xc1   :  { %p2110_p11 = scmp.lt.s32.totalorder %s2337_s15, %s2106_s21 }
  0xc3   :  { %p2111_p12 = por %p2110_p11, %p2109_p10 }
  0xc5   :  { %p2112_p13 = pnand %p2111_p12, %p2107_p9 }
  0xc7   :  { %2115 = shalt.err (!%p2112_p13)  }
  0xc8   :  { %312 = dma.hbm_to_vmem [thread:$0]  %s308_s23, 16, %s310_s28, [#allocation3 + $0xe] }
  0xc9   :  { %s325_s26 = sshll.u32 %s315_s8, 4  ;;  %s331_s12 = scalar_lea.hbm %s2635_s2, %s2452_s17  ;;  %s326_s26 = int_to_ptr.hbm [resolvable:$true] %s325_s26 }
  0xca   :  { %s2128_s29 = sshra.s32 %s326_s26, 4  ;;  %s2129_s29 = int_to_ptr.hbm [resolvable:$true] %s2128_s29 }
  0xcb   :  { %s2130_s14 = scalar_lea.hbm %s2129_s29, 1  ;;  %p2133_p1 = scmp.lt.s32.totalorder %s2129_s29, %s2634_s1 }
  0xcc   :  { %p2131_p0 = scmp.ne.s32.totalorder %s2129_s29, %s2130_s14  ;;  %p2134_p2 = scmp.lt.s32.totalorder %s2324_s24, %s2130_s14 }
  0xce   :  { %p2135_p3 = por %p2134_p2, %p2133_p1 }
  0xd0   :  { %p2136_p4 = pnand %p2135_p3, %p2131_p0 }
  0xd2   :  { %2139 = shalt.err (!%p2136_p4)  }
  0xd3   :  { %330 = dma.hbm_to_vmem [thread:$0]  %s326_s26, 16, %s328_s10, [#allocation3 + $0x7] }
  0xd4   :  { %s341_s28 = sshll.u32 %s331_s12, 4  ;;  %s342_s28 = int_to_ptr.hbm [resolvable:$true] %s341_s28 }
  0xd5   :  { %s2152_s19 = sshra.s32 %s342_s28, 4  ;;  %s2153_s19 = int_to_ptr.hbm [resolvable:$true] %s2152_s19 }
  0xd6   :  { %s2154_s17 = scalar_lea.hbm %s2153_s19, 1  ;;  %p2157_p6 = scmp.lt.s32.totalorder %s2153_s19, %s2635_s2 }
  0xd7   :  { %p2155_p5 = scmp.ne.s32.totalorder %s2153_s19, %s2154_s17  ;;  %p2158_p7 = scmp.lt.s32.totalorder %s2337_s15, %s2154_s17 }
  0xd9   :  { %p2159_p8 = por %p2158_p7, %p2157_p6 }
  0xdb   :  { %p2160_p9 = pnand %p2159_p8, %p2155_p5 }
  0xdd   :  { %2163 = shalt.err (!%p2160_p9)  }
  0xde   :  { %346 = dma.hbm_to_vmem [thread:$0]  %s342_s28, 16, %s344_s30, [#allocation3 + $0xf] }
  0xdf   :  { %2184 = dma.done.wait [#allocation3], 16 }
  0xe0   :  { %2185 = vsyncadd [#allocation3], 4294967280 }
  0xe1   :  { %2186 = dma.done.wait [#allocation3 + $0x8], 16 }
  0xe2   :  { %2187 = vsyncadd [#allocation3 + $0x8], 4294967280 }
  0xe3   :  { %2188 = dma.done.wait [#allocation3 + $0x1], 16 }
  0xe4   :  { %2189 = vsyncadd [#allocation3 + $0x1], 4294967280 }
  0xe5   :  { %2190 = dma.done.wait [#allocation3 + $0x9], 16 }
  0xe6   :  { %2191 = vsyncadd [#allocation3 + $0x9], 4294967280 }
  0xe7   :  { %2192 = dma.done.wait [#allocation3 + $0x2], 16 }
  0xe8   :  { %2193 = vsyncadd [#allocation3 + $0x2], 4294967280 }
  0xe9   :  { %2194 = dma.done.wait [#allocation3 + $0xa], 16 }
  0xea   :  { %2195 = vsyncadd [#allocation3 + $0xa], 4294967280 }
  0xeb   :  { %2196 = dma.done.wait [#allocation3 + $0x3], 16 }
  0xec   :  { %2197 = vsyncadd [#allocation3 + $0x3], 4294967280 }
  0xed   :  { %2198 = dma.done.wait [#allocation3 + $0xb], 16 }
  0xee   :  { %2199 = vsyncadd [#allocation3 + $0xb], 4294967280 }
  0xef   :  { %2200 = dma.done.wait [#allocation3 + $0x4], 16 }
  0xf0   :  { %2201 = vsyncadd [#allocation3 + $0x4], 4294967280 }
  0xf1   :  { %2202 = dma.done.wait [#allocation3 + $0xc], 16 }
  0xf2   :  { %2203 = vsyncadd [#allocation3 + $0xc], 4294967280 }
  0xf3   :  { %2204 = dma.done.wait [#allocation3 + $0x5], 16 }
  0xf4   :  { %2205 = vsyncadd [#allocation3 + $0x5], 4294967280 }
  0xf5   :  { %2206 = dma.done.wait [#allocation3 + $0xd], 16 }
  0xf6   :  { %2207 = vsyncadd [#allocation3 + $0xd], 4294967280 }
  0xf7   :  { %2208 = dma.done.wait [#allocation3 + $0x6], 16 }
  0xf8   :  { %2209 = vsyncadd [#allocation3 + $0x6], 4294967280 }
  0xf9   :  { %2210 = dma.done.wait [#allocation3 + $0xe], 16 }
  0xfa   :  { %2211 = vsyncadd [#allocation3 + $0xe], 4294967280 }
  0xfb   :  { %2212 = dma.done.wait [#allocation3 + $0x7], 16 }
  0xfc   :  { %2213 = vsyncadd [#allocation3 + $0x7], 4294967280 }
  0xfd   :  { %2214 = dma.done.wait [#allocation3 + $0xf], 16 }
  0xfe   :  { %2215 = vsyncadd [#allocation3 + $0xf], 4294967280  ;;  %v2481_v1 = vld [vmem:[#allocation2] sm:$0xff]  ;;  %s2238_s1 = smov 127   ;;  %s2239_s2 = smov 1   ;;  %v2486_v2 = vld [vmem:[#allocation2 + $0x8] sm:$0xff]  ;;  %v382_v3 = vlaneseq }
  0xff   :  { %398 = vrot.lane.b32.xlu1 %v2481_v1, %s2238_s1  ;;  %387 = vrot.lane.b32.xlu0 %v2481_v1, %s2239_s2  ;;  %s2491_s24 = sld [smem:[#allocation7 + $0x2]]  ;;  %v1624_v5 = vld [vmem:[#allocation12 + $0x38] sm:$0xff]  ;;  %v1623_v12 = vld [vmem:[#allocation12 + $0x30] sm:$0xff]  ;;  %v1622_v24 = vld [vmem:[#allocation12 + $0x28] sm:$0xff]  ;;  %vm1179_vm6 = vcmask 7168  }
 0x100   :  { %s2493_s15 = sld [smem:[#allocation7 + $0x82]]  ;;  %v2509_v4 = vand.u32 127, %v382_v3  ;;  %v1632_v6 = vld [vmem:[#allocation12 + $0x78] sm:$0xff]  ;;  %1043 = vmatpush.bf16.msra.mxu0 %v1624_v5  ;;  %v1631_v13 = vld [vmem:[#allocation12 + $0x70] sm:$0xff]  ;;  %v1630_v29 = vld [vmem:[#allocation12 + $0x68] sm:$0xff] }
 0x101   :  { %s2495_s10 = sld [smem:[#allocation7 + $0x102]]  ;;  %v1640_v7 = vld [vmem:[#allocation12 + $0xb8] sm:$0xff]  ;;  %1056 = vmatpush.bf16.msra.mxu1 %v1632_v6  ;;  %v1639_v14 = vld [vmem:[#allocation12 + $0xb0] sm:$0xff]  ;;  %v1638_v30 = vld [vmem:[#allocation12 + $0xa8] sm:$0xff] }
 0x102   :  { %s2497_s23 = sld [smem:[#allocation7 + $0x182]]  ;;  %v1648_v10 = vld [vmem:[#allocation12 + $0xf8] sm:$0xff]  ;;  %v384_v11 = vadd.s32 128, %v2509_v4  ;;  %1069 = vmatpush.bf16.msra.mxu2 %v1640_v7  ;;  %v1647_v15 = vld [vmem:[#allocation12 + $0xf0] sm:$0xff]  ;;  %vm402_vm0 = vcmp.lt.s32.totalorder %v2509_v4, 127  ;;  %vm385_vm2 = vcmp.eq.s32.totalorder %v2509_v4, 0 }
 0x103   :  { %s2499_s22 = sld [smem:[#allocation7]]  ;;  %1082 = vmatpush.bf16.msra.mxu3 %v1648_v10  ;;  %vm391_vm3 = vcmp.lt.s32.totalorder %v2509_v4, 1  ;;  %v1646_v35 = vld [vmem:[#allocation12 + $0xe8] sm:$0xff]  ;;  %v1621_v46 = vld [vmem:[#allocation12 + $0x20] sm:$0xff] }
 0x104   :  { %s2501_s30 = sld [smem:[#allocation7 + $0x1]]  ;;  %vm397_vm1 = vcmp.eq.s32.totalorder %v384_v11, 255  ;;  %1044 = vmatpush.bf16.msra.mxu0 %v1623_v12  ;;  %v1629_v51 = vld [vmem:[#allocation12 + $0x60] sm:$0xff]  ;;  %v1725_v4 = vld [vmem:[%s2639_s6] ss:$0 sm:$0xff] }
 0x105   :  { %s2503_s0 = sld [smem:[#allocation7 + $0x80]]  ;;  %v418_v16 = vstv %s2491_s24  ;;  %1057 = vmatpush.bf16.msra.mxu1 %v1631_v13  ;;  %v1637_v56 = vld [vmem:[#allocation12 + $0xa0] sm:$0xff]  ;;  %v1636_v13 = vld [vmem:[#allocation12 + $0x98] sm:$0xff] }
 0x106   :  { %s2505_s13 = sld [smem:[#allocation7 + $0x101]]  ;;  %v446_v17 = vstv %s2493_s15  ;;  %1070 = vmatpush.bf16.msra.mxu2 %v1639_v14  ;;  %v1645_v61 = vld [vmem:[#allocation12 + $0xe0] sm:$0xff] }
 0x107   :  { %400 = vrot.lane.b32.xlu1 %v2486_v2, %s2238_s1  ;;  %389 = vrot.lane.b32.xlu0 %v2486_v2, %s2239_s2  ;;  %s2507_s8 = sld [smem:[#allocation7 + $0x181]]  ;;  %v474_v18 = vstv %s2495_s10 }
 0x108   :  { %s2511_s25 = sld [smem:[#allocation7 + $0x81]]  ;;  %v502_v20 = vstv %s2497_s23  ;;  %1083 = vmatpush.bf16.msra.mxu3 %v1647_v15  ;;  %1045 = vmatpush.bf16.msra.mxu0 %v1622_v24 }
 0x109   :  { %s2513_s21 = sld [smem:[#allocation7 + $0x100]]  ;;  %v408_v25 = vstv %s2499_s22  ;;  %1058 = vmatpush.bf16.msra.mxu1 %v1630_v29  ;;  %v1627_v29 = vld [vmem:[#allocation12 + $0x50] sm:$0xff] }
 0x10a   :  { %s2515_s5 = sld [smem:[#allocation7 + $0x180]]  ;;  %v412_v19 = vstv %s2501_s30  ;;  %1071 = vmatpush.bf16.msra.mxu2 %v1638_v30 }
 0x10b   :  { %s2517_s18 = sld [smem:[#allocation10 + $0x3]]  ;;  %v414_v26 = vmul.f32 %v412_v19, %v2486_v2  ;;  %v436_v27 = vstv %s2503_s0  ;;  %v413_v34 = vmul.f32 %v412_v19, %v2481_v1  ;;  %v1644_v19 = vld [vmem:[#allocation12 + $0xd8] sm:$0xff] }
 0x10c   :  { %s2520_s26 = sld [smem:[#allocation10 + $0x2]]  ;;  %v468_v21 = vstv %s2505_s13  ;;  %1084 = vmatpush.bf16.msra.mxu3 %v1646_v35  ;;  %1046 = vmatpush.bf16.msra.mxu0 %v1621_v46  ;;  %v1635_v35 = vld [vmem:[#allocation12 + $0x90] sm:$0xff] }
 0x10d   :  { %s2522_s27 = sld [smem:[#allocation10 + $0x1]]  ;;  %v496_v22 = vstv %s2507_s8  ;;  %v470_v31 = vmul.f32 %v468_v21, %v2486_v2  ;;  %v469_v38 = vmul.f32 %v468_v21, %v2481_v1  ;;  %1059 = vmatpush.bf16.msra.mxu1 %v1629_v51 }
 0x10e   :  { %v440_v23 = vstv %s2511_s25  ;;  %v498_v33 = vmul.f32 %v496_v22, %v2486_v2  ;;  %v497_v39 = vmul.f32 %v496_v22, %v2481_v1  ;;  %s2565_s16 = sld [smem:[#allocation10]]  ;;  %1072 = vmatpush.bf16.msra.mxu2 %v1637_v56  ;;  %v1680_v56 = vld [vmem:[#allocation12 + $0x1f8] sm:$0xff] }
 0x10f   :  { %v464_v28 = vstv %s2513_s21  ;;  %v441_v40 = vmul.f32 %v440_v23, %v2481_v1  ;;  %v442_v41 = vmul.f32 %v440_v23, %v2486_v2  ;;  %v1620_v2 = vld [vmem:[#allocation12 + $0x18] sm:$0xff] }
 0x110   :  { %v492_v32 = vstv %s2515_s5  ;;  %1085 = vmatpush.bf16.msra.mxu3 %v1645_v61  ;;  %1047 = vmatpush.bf16.msra.mxu0 %v1620_v2  ;;  %v1654_v61 = vld [vmem:[#allocation12 + $0x128] sm:$0xff]  ;;  %v1661_v2 = vld [vmem:[#allocation12 + $0x160] sm:$0xff] }
 0x111   :  { %v508_v48 = vstv %s2517_s18 }
 0x112   :  { %v480_v49 = vstv %s2520_s26  ;;  %1073 = vmatpush.bf16.msra.mxu2 %v1636_v13  ;;  %v1675_v13 = vld [vmem:[#allocation12 + $0x1d0] sm:$0xff] }
 0x113   :  { %v452_v50 = vstv %s2522_s27 }
 0x114   :  { %1086 = vmatpush.bf16.msra.mxu3 %v1644_v19  ;;  %v1649_v19 = vld [vmem:[#allocation12 + $0x100] sm:$0xff] }
 0x116   :  { %1074 = vmatpush.bf16.msra.mxu2 %v1635_v35 }
 0x171   :  { %v399_v8 = vpop.permute.xlu1 %398  ;;  %v388_v9 = vpop.permute.xlu0 %387 }
 0x179   :  { %v401_v36 = vpop.permute.xlu1 %400  ;;  %v390_v37 = vpop.permute.xlu0 %389 }
 0x17a   :  { %v403_v42 = vsel %vm402_vm0, %v399_v8, %v401_v36  ;;  %v404_v43 = vsel %vm402_vm0, %v401_v36, %v399_v8  ;;  %v392_v44 = vsel %vm391_vm3, %v388_v9, %v390_v37  ;;  %v393_v45 = vsel %vm391_vm3, %v390_v37, %v388_v9  ;;  %v1628_v8 = vld [vmem:[#allocation12 + $0x58] sm:$0xff] }
 0x17b   :  { %v406_v47 = vsel %vm397_vm1, 0.0, %v404_v43  ;;  %v447_v53 = vmul.f32 %v446_v17, %v403_v42  ;;  %v475_v55 = vmul.f32 %v474_v18, %v403_v42  ;;  %v394_v58 = vsel %vm385_vm2, 0.0, %v393_v45  ;;  %1060 = vmatpush.bf16.msra.mxu1 %v1628_v8  ;;  %v1626_v43 = vld [vmem:[#allocation12 + $0x48] sm:$0xff]  ;;  %v1668_v8 = vld [vmem:[#allocation12 + $0x198] sm:$0xff] }
 0x17c   :  { %v420_v52 = vmul.f32 %v418_v16, %v406_v47  ;;  %v448_v54 = vmul.f32 %v446_v17, %v406_v47  ;;  %v476_v57 = vmul.f32 %v474_v18, %v406_v47  ;;  %v410_v59 = vmul.f32 %v408_v25, %v392_v44 }
 0x17d   :  { %v438_v60 = vmul.f32 %v436_v27, %v392_v44  ;;  %v409_v62 = vmul.f32 %v408_v25, %v394_v58  ;;  %v437_v63 = vmul.f32 %v436_v27, %v394_v58  ;;  %v465_v0 = vmul.f32 %v464_v28, %v394_v58  ;;  %v1619_v25 = vld [vmem:[#allocation12 + $0x10] sm:$0xff] }
 0x17e   :  { %v466_v1 = vmul.f32 %v464_v28, %v392_v44  ;;  %v504_v3 = vmul.f32 %v502_v20, %v406_v47  ;;  %v493_v5 = vmul.f32 %v492_v32, %v394_v58  ;;  %v494_v6 = vmul.f32 %v492_v32, %v392_v44  ;;  %1048 = vmatpush.bf16.msra.mxu0 %v1619_v25  ;;  %v1634_v44 = vld [vmem:[#allocation12 + $0x88] sm:$0xff]  ;;  %v1663_v58 = vld [vmem:[#allocation12 + $0x170] sm:$0xff] }
 0x17f   :  { %v444_v7 = vadd.f32 %v442_v41, %v438_v60  ;;  %v503_v9 = vmul.f32 %v502_v20, %v403_v42  ;;  %v471_v10 = vadd.f32 %v469_v38, %v465_v0  ;;  %v443_v12 = vadd.f32 %v441_v40, %v437_v63  ;;  %v1618_v40 = vld [vmem:[#allocation12 + $0x8] sm:$0xff]  ;;  %1061 = vmatpush.bf16.msra.mxu1 %v1627_v29  ;;  %v1679_v60 = vld [vmem:[#allocation12 + $0x1f0] sm:$0xff] }
 0x180   :  { %v472_v11 = vadd.f32 %v470_v31, %v466_v1  ;;  %v416_v14 = vadd.f32 %v414_v26, %v410_v59  ;;  %v499_v15 = vadd.f32 %v497_v39, %v493_v5  ;;  %v500_v17 = vadd.f32 %v498_v33, %v494_v6  ;;  %v1643_v39 = vld [vmem:[#allocation12 + $0xd0] sm:$0xff]  ;;  %v1642_v47 = vld [vmem:[#allocation12 + $0xc8] sm:$0xff]  ;;  %1075 = vmatpush.bf16.msra.mxu2 %v1634_v44  ;;  %v1653_v1 = vld [vmem:[#allocation12 + $0x120] sm:$0xff] }
 0x181   :  { %v450_v18 = vadd.f32 %v448_v54, %v444_v7  ;;  %v415_v21 = vadd.f32 %v413_v34, %v409_v62  ;;  %v477_v22 = vadd.f32 %v475_v55, %v471_v10  ;;  %v449_v24 = vadd.f32 %v447_v53, %v443_v12  ;;  %1087 = vmatpush.bf16.msra.mxu3 %v1643_v39  ;;  %v1656_v53 = vld [vmem:[#allocation12 + $0x138] sm:$0xff]  ;;  %v1671_v59 = vld [vmem:[#allocation12 + $0x1b0] sm:$0xff]  ;;  %v1662_v62 = vld [vmem:[#allocation12 + $0x168] sm:$0xff] }
 0x182   :  { %v478_v23 = vadd.f32 %v476_v57, %v472_v11  ;;  %v505_v27 = vadd.f32 %v503_v9, %v499_v15  ;;  %v506_v20 = vadd.f32 %v504_v3, %v500_v17  ;;  %v419_v26 = vmul.f32 %v418_v16, %v403_v42  ;;  %1049 = vmatpush.bf16.msra.mxu0 %v1618_v40  ;;  %v1664_v54 = vld [vmem:[#allocation12 + $0x178] sm:$0xff]  ;;  %v1655_v57 = vld [vmem:[#allocation12 + $0x130] sm:$0xff]  ;;  %v1670_v63 = vld [vmem:[#allocation12 + $0x1a8] sm:$0xff] }
 0x183   :  { %v2569_v28 = vadd.f32 %v452_v50, %v450_v18  ;;  %v2573_v30 = vadd.f32 %v480_v49, %v477_v22  ;;  %v2577_v32 = vadd.f32 %v452_v50, %v449_v24  ;;  %v422_v38 = vadd.f32 %v420_v52, %v416_v14  ;;  %1062 = vmatpush.bf16.msra.mxu1 %v1626_v43  ;;  %v1633_v50 = vld [vmem:[#allocation12 + $0x80] sm:$0xff]  ;;  %v1672_v55 = vld [vmem:[#allocation12 + $0x1b8] sm:$0xff]  ;;  %v1678_v0 = vld [vmem:[#allocation12 + $0x1e8] sm:$0xff] }
 0x184   :  { %v2575_v31 = vadd.f32 %v480_v49, %v478_v23  ;;  %v2579_v33 = vadd.f32 %v508_v48, %v505_v27  ;;  %v2581_v34 = vadd.f32 %v508_v48, %v506_v20  ;;  %v421_v37 = vadd.f32 %v419_v26, %v415_v21  ;;  %v1617_v48 = vld [vmem:[#allocation12] sm:$0xff]  ;;  %1076 = vmatpush.bf16.msra.mxu2 %v1633_v50  ;;  %v1652_v6 = vld [vmem:[#allocation12 + $0x118] sm:$0xff]  ;;  %v1651_v10 = vld [vmem:[#allocation12 + $0x110] sm:$0xff] }
 0x185   :  { %v1705_v16 = vpack.i.bf16 %v2569_v28, %v2577_v32  ;;  %v424_v42 = vstv %s2565_s16  ;;  %v1625_v49 = vld [vmem:[#allocation12 + $0x40] sm:$0xff]  ;;  %1088 = vmatpush.bf16.msra.mxu3 %v1642_v47  ;;  %v1660_v7 = vld [vmem:[#allocation12 + $0x158] sm:$0xff]  ;;  %v1659_v11 = vld [vmem:[#allocation12 + $0x150] sm:$0xff] }
 0x186   :  { %v1720_v36 = vpack.i.bf16 %v2575_v31, %v2573_v30  ;;  %v1715_v41 = vpack.i.bf16 %v2581_v34, %v2579_v33  ;;  %v2593_v45 = vadd.f32 %v424_v42, %v421_v37  ;;  %v2595_v46 = vadd.f32 %v424_v42, %v422_v38  ;;  %1050 = vmatpush.bf16.msra.mxu0 %v1617_v48  ;;  %v1641_v52 = vld [vmem:[#allocation12 + $0xc0] sm:$0xff]  ;;  %v1676_v9 = vld [vmem:[#allocation12 + $0x1d8] sm:$0xff]  ;;  %v1667_v12 = vld [vmem:[#allocation12 + $0x190] sm:$0xff] }
 0x187   :  { %1706 = vrot.lane.b32.xlu2 %v1705_v16, %s2238_s1  ;;  %1063 = vmatpush.bf16.msra.mxu1 %v1625_v49  ;;  %v1669_v3 = vld [vmem:[#allocation12 + $0x1a0] sm:$0xff]  ;;  %v1650_v14 = vld [vmem:[#allocation12 + $0x108] sm:$0xff] }
 0x188   :  { %1721 = vrot.lane.b32.xlu1 %v1720_v36, %s2238_s1  ;;  %1716 = vrot.lane.b32.xlu0 %v1715_v41, %s2238_s1  ;;  %v1710_v51 = vpack.i.bf16 %v2595_v46, %v2593_v45  ;;  %v1677_v5 = vld [vmem:[#allocation12 + $0x1e0] sm:$0xff]  ;;  %v1658_v15 = vld [vmem:[#allocation12 + $0x148] sm:$0xff] }
 0x189   :  { %1089 = vmatpush.bf16.msra.mxu3 %v1641_v52  ;;  %1121 = vmatpush.bf16.msrb.mxu2 %v1672_v55  ;;  %v1666_v17 = vld [vmem:[#allocation12 + $0x188] sm:$0xff]  ;;  %v1657_v21 = vld [vmem:[#allocation12 + $0x140] sm:$0xff] }
 0x18a   :  { %1095 = vmatpush.bf16.msrb.mxu0 %v1656_v53  ;;  %v1674_v18 = vld [vmem:[#allocation12 + $0x1c8] sm:$0xff]  ;;  %v1665_v22 = vld [vmem:[#allocation12 + $0x180] sm:$0xff] }
 0x18b   :  { %1108 = vmatpush.bf16.msrb.mxu1 %v1664_v54  ;;  %v1673_v23 = vld [vmem:[#allocation12 + $0x1c0] sm:$0xff] }
 0x18d   :  { %1134 = vmatpush.bf16.msrb.mxu3 %v1680_v56  ;;  %1122 = vmatpush.bf16.msrb.mxu2 %v1671_v59 }
 0x18e   :  { %1096 = vmatpush.bf16.msrb.mxu0 %v1655_v57 }
 0x18f   :  { %1711 = vrot.lane.b32.xlu2 %v1710_v51, %s2238_s1  ;;  %1109 = vmatpush.bf16.msrb.mxu1 %v1663_v58 }
 0x191   :  { %1135 = vmatpush.bf16.msrb.mxu3 %v1679_v60  ;;  %1123 = vmatpush.bf16.msrb.mxu2 %v1670_v63 }
 0x192   :  { %1097 = vmatpush.bf16.msrb.mxu0 %v1654_v61 }
 0x193   :  { %1110 = vmatpush.bf16.msrb.mxu1 %v1662_v62 }
 0x195   :  { %1136 = vmatpush.bf16.msrb.mxu3 %v1678_v0  ;;  %1124 = vmatpush.bf16.msrb.mxu2 %v1669_v3 }
 0x196   :  { %1098 = vmatpush.bf16.msrb.mxu0 %v1653_v1 }
 0x197   :  { %1111 = vmatpush.bf16.msrb.mxu1 %v1661_v2 }
 0x199   :  { %1137 = vmatpush.bf16.msrb.mxu3 %v1677_v5  ;;  %1125 = vmatpush.bf16.msrb.mxu2 %v1668_v8 }
 0x19a   :  { %1099 = vmatpush.bf16.msrb.mxu0 %v1652_v6 }
 0x19b   :  { %1112 = vmatpush.bf16.msrb.mxu1 %v1660_v7 }
 0x19d   :  { %1138 = vmatpush.bf16.msrb.mxu3 %v1676_v9  ;;  %1126 = vmatpush.bf16.msrb.mxu2 %v1667_v12 }
 0x19e   :  { %1100 = vmatpush.bf16.msrb.mxu0 %v1651_v10 }
 0x19f   :  { %1113 = vmatpush.bf16.msrb.mxu1 %v1659_v11 }
 0x1a1   :  { %1139 = vmatpush.bf16.msrb.mxu3 %v1675_v13  ;;  %1127 = vmatpush.bf16.msrb.mxu2 %v1666_v17 }
 0x1a2   :  { %1101 = vmatpush.bf16.msrb.mxu0 %v1650_v14 }
 0x1a3   :  { %1114 = vmatpush.bf16.msrb.mxu1 %v1658_v15 }
 0x1a5   :  { %1140 = vmatpush.bf16.msrb.mxu3 %v1674_v18  ;;  %1128 = vmatpush.bf16.msrb.mxu2 %v1665_v22  ;;  %v1726_v18 = vld [vmem:[%s2640_s7] ss:$0 sm:$0xff] }
 0x1a6   :  { %1102 = vmatpush.bf16.msrb.mxu0 %v1649_v19 }
 0x1a7   :  { %1115 = vmatpush.bf16.msrb.mxu1 %v1657_v21 }
 0x1a9   :  { %1141 = vmatpush.bf16.msrb.mxu3 %v1673_v23 }
 0x1e1   :  { %v1707_v24 = vpop.permute.xlu2 %1706 }
 0x1e2   :  { %v1709_v25 = vunpack.i.h.bf16 %v1707_v24  ;;  %v1708_v27 = vunpack.i.l.bf16 %v1707_v24  ;;  %v1727_v24 = vld [vmem:[#allocation6] ss:$0 sm:$0xff] }
 0x1e4   :  { %v459_v20 = vsel %vm402_vm0, %v1708_v27, %v1709_v25  ;;  %v460_v29 = vsel %vm402_vm0, %v1709_v25, %v1708_v27 }
 0x1e5   :  { %v461_v26 = vmax.f32 %v2577_v32, %v459_v20  ;;  %v462_v35 = vmax.f32 %v2569_v28, %v460_v29 }
 0x1e7   :  { %v521_v36 = vpack.c.bf16 %v461_v26, %v461_v26  ;;  %v522_v16 = vpack.c.bf16 %v462_v35, %v462_v35 }
 0x1e9   :  { %1077 = vmatmul.bf16.vlgmr.msra.gmra.mxu2 %v521_v36  ;;  %1090 = vmatmul.bf16.vlgmr.msra.gmra.mxu3 %v522_v16  ;;  %v1712_v37 = vpop.permute.xlu2 %1711 }
 0x1ea   :  { %v1714_v38 = vunpack.i.h.bf16 %v1712_v37  ;;  %v1713_v39 = vunpack.i.l.bf16 %v1712_v37 }
 0x1ec   :  { %v431_v40 = vsel %vm402_vm0, %v1713_v39, %v1714_v38  ;;  %v432_v41 = vsel %vm402_vm0, %v1714_v38, %v1713_v39 }
 0x1ed   :  { %v433_v42 = vmax.f32 %v2593_v45, %v431_v40  ;;  %v434_v43 = vmax.f32 %v2595_v46, %v432_v41 }
 0x1ef   :  { %v519_v32 = vpack.c.bf16 %v433_v42, %v433_v42  ;;  %v520_v44 = vpack.c.bf16 %v434_v43, %v434_v43 }
 0x1f1   :  { %1051 = vmatmul.bf16.vlgmr.msra.gmra.mxu0 %v519_v32  ;;  %1064 = vmatmul.bf16.vlgmr.msra.gmra.mxu1 %v520_v44 }
 0x1fa   :  { %v1722_v28 = vpop.permute.xlu1 %1721  ;;  %v1717_v47 = vpop.permute.xlu0 %1716 }
 0x1fb   :  { %v1724_v48 = vunpack.i.h.bf16 %v1722_v28  ;;  %v1723_v49 = vunpack.i.l.bf16 %v1722_v28  ;;  %v1719_v50 = vunpack.i.h.bf16 %v1717_v47  ;;  %v1718_v51 = vunpack.i.l.bf16 %v1717_v47 }
 0x1fd   :  { %v487_v52 = vsel %vm402_vm0, %v1723_v49, %v1724_v48  ;;  %v488_v53 = vsel %vm402_vm0, %v1724_v48, %v1723_v49  ;;  %v515_v45 = vsel %vm402_vm0, %v1718_v51, %v1719_v50  ;;  %v516_v46 = vsel %vm402_vm0, %v1719_v50, %v1718_v51 }
 0x1fe   :  { %v489_v54 = vmax.f32 %v2573_v30, %v487_v52  ;;  %v490_v55 = vmax.f32 %v2575_v31, %v488_v53  ;;  %v517_v56 = vmax.f32 %v2579_v33, %v515_v45  ;;  %v518_v57 = vmax.f32 %v2581_v34, %v516_v46 }
 0x200   :  { %v523_v58 = vpack.c.bf16 %v489_v54, %v489_v54  ;;  %v524_v59 = vpack.c.bf16 %v490_v55, %v490_v55  ;;  %v525_v60 = vpack.c.bf16 %v517_v56, %v517_v56  ;;  %v526_v61 = vpack.c.bf16 %v518_v57, %v518_v57 }
 0x202   :  { %1103 = vmatmul.bf16.vlgmr.msrb.gmra.mxu0 %v523_v58  ;;  %1116 = vmatmul.bf16.vlgmr.msrb.gmra.mxu1 %v524_v59 }
 0x203   :  { %1129 = vmatmul.bf16.vlgmr.msrb.gmra.mxu2 %v525_v60  ;;  %1142 = vmatmul.bf16.vlgmr.msrb.gmra.mxu3 %v526_v61 }
 0x26c   :  { %v1078_v62 = vpop.f32.mrf.mxu2  ;;  %v1091_v63 = vpop.f32.mrf.mxu3 }
 0x26e   :  { %v1052_v30 = vpop.f32.mrf.mxu0  ;;  %v1065_v31 = vpop.f32.mrf.mxu1 }
 0x26f   :  { %v1053_v0 = vadd.f32 %v1725_v4, %v1052_v30 }
 0x271   :  { %v1066_v34 = vadd.f32 %v1065_v31, %v1053_v0 }
 0x273   :  { %v1079_v5 = vadd.f32 %v1078_v62, %v1066_v34 }
 0x274   :  { %v1080_v33 = vpop.f32.mrf.mxu2  ;;  %v1093_v1 = vpop.f32.mrf.mxu3 }
 0x275   :  { %v1092_v6 = vadd.f32 %v1091_v63, %v1079_v5 }
 0x276   :  { %v1054_v2 = vpop.f32.mrf.mxu0  ;;  %v1067_v3 = vpop.f32.mrf.mxu1 }
 0x27f   :  { %v1104_v7 = vpop.f32.mrf.mxu0  ;;  %v1117_v8 = vpop.f32.mrf.mxu1 }
 0x280   :  { %v1105_v9 = vadd.f32 %v1104_v7, %v1092_v6 }
 0x282   :  { %v1118_v10 = vadd.f32 %v1117_v8, %v1105_v9 }
 0x286   :  { %v1130_v11 = vpop.f32.mrf.mxu2  ;;  %v1143_v12 = vpop.f32.mrf.mxu3 }
 0x287   :  { %v1131_v13 = vadd.f32 %v1130_v11, %v1118_v10  ;;  %v1106_v14 = vpop.f32.mrf.mxu0  ;;  %v1119_v15 = vpop.f32.mrf.mxu1 }
 0x289   :  { %v1144_v17 = vadd.f32 %v1143_v12, %v1131_v13 }
 0x28b   :  { %v1147_v19 = vmax.f32 %v1144_v17, 0.0 }
 0x28d   :  { %v1152_v21 = vmul.f32 %v1726_v18, %v1147_v19 }
 0x28e   :  { %v1132_v22 = vpop.f32.mrf.mxu2  ;;  %v1145_v23 = vpop.f32.mrf.mxu3 }
 0x28f   :  { %1153 = vadd.xlane.f32.xlu2 %v1152_v21 }
 0x302   :  { %v1154_v25 = vpop.xlane.xlu2 %1153 }
 0x303   :  { %v1159_v27 = vadd.f32 %v1727_v24, %v1154_v25 }
 0x305   :  { %v1600_v20 = vmul.f32 -1.442695, %v1159_v27 }
 0x307   :  { %1728 = vpow2.f32 %v1600_v20 }
 0x30d   :  { %v1729_v29 = vpop.eup %1728 }
 0x30e   :  { %v1163_v26 = vadd.f32 1.0, %v1729_v29 }
 0x310   :  { %1730 = vrcp.f32 %v1163_v26  ;;  %v1175_v37 = vand.u32 2147483648, %v1163_v26  ;;  %v1173_v39 = vand.u32 2147483647, %v1163_v26  ;;  %vm1169_vm5 = vweird.f32 %v1163_v26 }
 0x312   :  { %v1176_v41 = vor.u32 1.1754944e-38, %v1175_v37  ;;  %vm1174_vm8 = vcmp.eq.f32.partialorder %v1173_v39, 8.507059e+37 }
 0x316   :  { %v1731_v35 = vpop.eup %1730 }
 0x317   :  { %v1165_v36 = vmul.f32 %v1731_v35, %v1163_v26  ;;  %vm1170_vm4 = vweird.f32 %v1731_v35 }
 0x318   :  { %vm1171_vm7 = vmor %vm1169_vm5, %vm1170_vm4 }
 0x319   :  { %v1166_v16 = vsub.f32 1.0, %v1165_v36 }
 0x31b   :  { %v1167_v38 = vmul.f32 %v1731_v35, %v1166_v16 }
 0x31d   :  { %v1168_v40 = vadd.f32 %v1731_v35, %v1167_v38 }
 0x31f   :  { %v1172_v42 = vsel %vm1171_vm7, %v1731_v35, %v1168_v40 }
 0x320   :  { %v1177_v43 = vsel %vm1174_vm8, %v1176_v41, %v1172_v42 }
 0x321   :  { %1180 = vst.msk [vmem:[%s2641_s9] sm:$0xff] %vm1179_vm6, %v1177_v43 }
 0x322   :  { %1185 = vsyncpa [#allocation8], 1 }
 0x323   :  { %1186 = vsyncpa [#allocation9], 1 }
 0x324   :  { %1187 = vsyncpa [#allocation11], 1 }
 0x325   :  { %1188 = vsyncmov [#allocation3] }
 0x328   :  { %s1189_s4 = vpop.sfrf %1188 }
 0x329   :  { %p1601_p10 = scmp.ne.s32.totalorder %s1189_s4, 0 }
 0x32b   :  { %1193 = shalt.err (%p1601_p10)  }
 0x32c   :  { %1195 = vsyncmov [#allocation3 + $0x1] }
 0x32f   :  { %s1196_s28 = vpop.sfrf %1195 }
 0x330   :  { %p1602_p11 = scmp.ne.s32.totalorder %s1196_s28, 0 }
 0x332   :  { %1200 = shalt.err (%p1602_p11)  }
 0x333   :  { %1202 = vsyncmov [#allocation3 + $0x2] }
 0x336   :  { %s1203_s19 = vpop.sfrf %1202 }
 0x337   :  { %p1603_p12 = scmp.ne.s32.totalorder %s1203_s19, 0 }
 0x339   :  { %1207 = shalt.err (%p1603_p12)  }
 0x33a   :  { %1209 = vsyncmov [#allocation3 + $0x3] }
 0x33d   :  { %s1210_s17 = vpop.sfrf %1209 }
 0x33e   :  { %p1604_p13 = scmp.ne.s32.totalorder %s1210_s17, 0 }
 0x340   :  { %1214 = shalt.err (%p1604_p13)  }
 0x341   :  { %1216 = vsyncmov [#allocation3 + $0x4] }
 0x344   :  { %s1217_s9 = vpop.sfrf %1216 }
 0x345   :  { %p1605_p0 = scmp.ne.s32.totalorder %s1217_s9, 0 }
 0x347   :  { %1221 = shalt.err (%p1605_p0)  }
 0x348   :  { %1223 = vsyncmov [#allocation3 + $0x5] }
 0x34b   :  { %s1224_s11 = vpop.sfrf %1223 }
 0x34c   :  { %p1606_p1 = scmp.ne.s32.totalorder %s1224_s11, 0 }
 0x34e   :  { %1228 = shalt.err (%p1606_p1)  }
 0x34f   :  { %1230 = vsyncmov [#allocation3 + $0x6] }
 0x352   :  { %s1231_s20 = vpop.sfrf %1230 }
 0x353   :  { %p1607_p2 = scmp.ne.s32.totalorder %s1231_s20, 0 }
 0x355   :  { %1235 = shalt.err (%p1607_p2)  }
 0x356   :  { %1237 = vsyncmov [#allocation3 + $0x7] }
 0x359   :  { %s1238_s1 = vpop.sfrf %1237 }
 0x35a   :  { %p1608_p3 = scmp.ne.s32.totalorder %s1238_s1, 0 }
 0x35c   :  { %1242 = shalt.err (%p1608_p3)  }
 0x35d   :  { %1244 = vsyncmov [#allocation3 + $0x8] }
 0x360   :  { %s1245_s2 = vpop.sfrf %1244 }
 0x361   :  { %p1609_p4 = scmp.ne.s32.totalorder %s1245_s2, 0 }
 0x363   :  { %1249 = shalt.err (%p1609_p4)  }
 0x364   :  { %1251 = vsyncmov [#allocation3 + $0x9] }
 0x367   :  { %s1252_s24 = vpop.sfrf %1251 }
 0x368   :  { %p1610_p5 = scmp.ne.s32.totalorder %s1252_s24, 0 }
 0x36a   :  { %1256 = shalt.err (%p1610_p5)  }
 0x36b   :  { %1258 = vsyncmov [#allocation3 + $0xa] }
 0x36e   :  { %s1259_s15 = vpop.sfrf %1258 }
 0x36f   :  { %p1611_p6 = scmp.ne.s32.totalorder %s1259_s15, 0 }
 0x371   :  { %1263 = shalt.err (%p1611_p6)  }
 0x372   :  { %1265 = vsyncmov [#allocation3 + $0xb] }
 0x375   :  { %s1266_s10 = vpop.sfrf %1265 }
 0x376   :  { %p1612_p7 = scmp.ne.s32.totalorder %s1266_s10, 0 }
 0x378   :  { %1270 = shalt.err (%p1612_p7)  }
 0x379   :  { %1272 = vsyncmov [#allocation3 + $0xc] }
 0x37c   :  { %s1273_s23 = vpop.sfrf %1272 }
 0x37d   :  { %p1613_p8 = scmp.ne.s32.totalorder %s1273_s23, 0 }
 0x37f   :  { %1277 = shalt.err (%p1613_p8)  }
 0x380   :  { %1279 = vsyncmov [#allocation3 + $0xd] }
 0x383   :  { %s1280_s22 = vpop.sfrf %1279 }
 0x384   :  { %p1614_p9 = scmp.ne.s32.totalorder %s1280_s22, 0 }
 0x386   :  { %1284 = shalt.err (%p1614_p9)  }
 0x387   :  { %1286 = vsyncmov [#allocation3 + $0xe] }
 0x38a   :  { %s1287_s30 = vpop.sfrf %1286 }
 0x38b   :  { %p1615_p10 = scmp.ne.s32.totalorder %s1287_s30, 0 }
 0x38d   :  { %1291 = shalt.err (%p1615_p10)  }
 0x38e   :  { %1293 = vsyncmov [#allocation3 + $0xf] }
 0x391   :  { %s1294_s0 = vpop.sfrf %1293 }
 0x392   :  { %p1616_p11 = scmp.ne.s32.totalorder %s1294_s0, 0 }
 0x394   :  { %1298 = shalt.err (%p1616_p11)  }

</bundles_post_ra>
